<compile_context>
chip_gen: v5e
topology: v5e:2x2
jax: 0.10.0
libtpu: 0.0.40
codegen_flags: <defaults>
</compile_context>

<pallas_src>
import functools

import jax
import jax.numpy as jnp
import numpy as np
from jax.experimental import pallas as pl
from jax.experimental.pallas import tpu as pltpu

KSIZE = 5
PAD = 2
LANE = 128


def _tree_sum(vals):
    vals = list(vals)
    while len(vals) > 1:
        nxt = [vals[i] + vals[i + 1] for i in range(0, len(vals) - 1, 2)]
        if len(vals) % 2:
            nxt.append(vals[-1])
        vals = nxt
    return vals[0]


def fused_lenet_kernel(x_ref, t1_ref, b1_ref, t2_ref, b2_ref, wd_ref, bd_ref,
                       out_ref, feat_ref, xpad_ref):
    """conv1+relu -> conv2+relu -> dense+relu for TB batch-stacked images.

    x_ref   : (TB, H, C*W)        channel-interleaved input slab (VMEM)
    t{1,2}  : (5, C*W, C*W)       Toeplitz conv weights; horizontal replicate
                                  padding is folded in via clamped columns
    b{1,2}  : (1, C*W)            conv bias repeated over W
    wd_ref  : (H, C*W, NCp)       dense weight in kernel-native (h, c*W+w) order
    bd_ref  : (1, NCp)            dense bias, lane-padded
    out_ref : (TB, 1, NCp)        relu(dense) logits (lane-dense, padded)
    feat_ref: (TB, H, C*W)        conv2 activations, kernel-native layout
    xpad_ref: (TB, H+2*PAD, C*W)  scratch: vertically replicate-padded acts
    """
    TB, H, CW = x_ref.shape

    def fill_padded(act):
        # Vertical replicate padding only (horizontal lives in the Toeplitz RHS):
        # one full interior store + 2*PAD full-width row stores.
        xpad_ref[:, PAD:PAD + H, :] = act
        top = act[:, 0:1, :]
        bot = act[:, H - 1:H, :]
        for p in range(PAD):
            xpad_ref[:, p:p + 1, :] = top
            xpad_ref[:, PAD + H + p:PAD + H + p + 1, :] = bot

    def conv_relu(t_ref, b_ref):
        # acc[tb*H + h, co*W + w] = sum_kh xpad[tb, h+kh, :] @ T[kh][:, co*W + w]
        dots = []
        for kh in range(KSIZE):
            lhs = xpad_ref[:, kh:kh + H, :].reshape(TB * H, CW)
            dots.append(jnp.dot(lhs, t_ref[kh],
                                preferred_element_type=jnp.float32))
        acc = _tree_sum(dots) + b_ref[...]
        return jnp.maximum(acc, 0.0).reshape(TB, H, CW)

    # ---- conv1 + relu ----
    fill_padded(x_ref[...])
    h1 = conv_relu(t1_ref, b1_ref)
    # ---- conv2 + relu (re-padding h1 is pure VMEM work) ----
    fill_padded(h1)
    h2 = conv_relu(t2_ref, b2_ref)
    # ---- feature: one lane-dense store; its writeback DMA overlaps the dense ----
    feat_ref[...] = h2
    # ---- dense + relu, consuming h2 directly (no round trip through feat_ref) ----
    dots = [jnp.dot(h2[:, h, :], wd_ref[h], preferred_element_type=jnp.float32)
            for h in range(H)]
    z = _tree_sum(dots) + bd_ref[...]
    out_ref[:, 0, :] = jnp.maximum(z, 0.0)


def _fused_lenet_call(xk, prep, tb):
    Bp, H, CW = xk.shape
    steps = Bp // tb
    NCp = prep["bd"].shape[1]
    KH = prep["t1"].shape[0]
    return pl.pallas_call(
        fused_lenet_kernel,
        out_shape=(jax.ShapeDtypeStruct((Bp, 1, NCp), jnp.float32),
                   jax.ShapeDtypeStruct((Bp, H, CW), jnp.float32)),
        grid=(steps,),
        in_specs=[
            pl.BlockSpec((tb, H, CW), lambda i: (i, 0, 0)),
            pl.BlockSpec((KH, CW, CW), lambda i: (0, 0, 0)),
            pl.BlockSpec((1, CW), lambda i: (0, 0)),
            pl.BlockSpec((KH, CW, CW), lambda i: (0, 0, 0)),
            pl.BlockSpec((1, CW), lambda i: (0, 0)),
            pl.BlockSpec((H, CW, NCp), lambda i: (0, 0, 0)),
            pl.BlockSpec((1, NCp), lambda i: (0, 0)),
        ],
        out_specs=(
            pl.BlockSpec((tb, 1, NCp), lambda i: (i, 0, 0)),
            pl.BlockSpec((tb, H, CW), lambda i: (i, 0, 0)),
        ),
        scratch_shapes=[pltpu.VMEM((tb, H + 2 * PAD, CW), jnp.float32)],
        compiler_params=pltpu.CompilerParams(
            dimension_semantics=("parallel",)),
    )(xk, prep["t1"], prep["b1"], prep["t2"], prep["b2"], prep["wd"], prep["bd"])


@functools.partial(jax.jit, static_argnums=(2, 3))
def modified_lenet_forward(x, prep, num_classes, block_batch=None):
    B, C, H, W = x.shape
    if block_batch is None:
        # Two "parallel" grid steps by default (both v7x TCs busy); on v5e/v6e
        # the extra step costs ~0.35us and the bigger M still amortizes it.
        block_batch = max(1, -(-B // 2))
    tb = min(block_batch, B)
    steps = -(-B // tb)
    Bp = steps * tb

    # Channel-interleaved, lane-dense input slab (B, H, C*W).
    xk = jnp.transpose(x, (0, 2, 1, 3)).reshape(B, H, C * W)
    if Bp != B:
        xk = jnp.pad(xk, ((0, Bp - B), (0, 0), (0, 0)))

    out_p, feat_k = _fused_lenet_call(xk, prep, tb)

    out = out_p[:B, 0, :num_classes]
    # Restore PyTorch (C, H, W) flatten order with a tiny wrapper-side permute.
    feat = (feat_k[:B].reshape(B, H, C, W).transpose(0, 2, 1, 3)
            .reshape(B, C * H * W))
    return out, feat


def prepare_params(params, data_size, num_classes):
    """One-time host-side repack of the module parameters into kernel layout."""
    C, H, W = data_size
    NCp = max(LANE, ((num_classes + LANE - 1) // LANE) * LANE)

    # Column-selection matrices with clamped (replicate) horizontal padding:
    # S[kw, wi, wo] += 1 where wi = clip(wo + kw - PAD, 0, W-1)
    S = np.zeros((KSIZE, W, W), np.float32)
    for kw in range(KSIZE):
        for wo in range(W):
            wi = min(max(wo + kw - PAD, 0), W - 1)
            S[kw, wi, wo] += 1.0

    def conv_to_toeplitz(wc):
        # T[kh, ci*W + wi, co*W + wo] = sum_kw wc[co, ci, kh, kw] * S[kw, wi, wo]
        wc = np.asarray(wc, np.float32)
        T = np.einsum("oikv,vpw->kipow", wc, S)
        return jnp.asarray(T.reshape(KSIZE, C * W, C * W))

    def bias_row(b):
        return jnp.asarray(np.repeat(np.asarray(b, np.float32), W)[None, :])

    # Dense weight repacked to kernel-native layout: wd[h, c*W + w, nc].
    wdn = np.asarray(params["dense_w"], np.float32).reshape(num_classes, C, H, W)
    wd = np.zeros((H, C * W, NCp), np.float32)
    wd[:, :, :num_classes] = np.transpose(wdn, (2, 1, 3, 0)).reshape(
        H, C * W, num_classes)
    bd = np.zeros((1, NCp), np.float32)
    bd[0, :num_classes] = np.asarray(params["dense_b"], np.float32)

    return dict(
        t1=conv_to_toeplitz(params["conv1_w"]), b1=bias_row(params["conv1_b"]),
        t2=conv_to_toeplitz(params["conv2_w"]), b2=bias_row(params["conv2_b"]),
        wd=jnp.asarray(wd), bd=jnp.asarray(bd),
    )


def init_params(data_size, num_classes):
    """Deterministic parameters exactly as Modified_LeNet.__init__ ('copy' mode):
    conv weights are per-channel identity (delta at center), biases zero;
    dense weight = ones / dim_in, bias zero."""
    C, H, W = data_size
    center = np.zeros((KSIZE, KSIZE), np.float32)
    center[2, 2] = 1.0
    conv_w = np.zeros((C, C, KSIZE, KSIZE), np.float32)
    for i in range(C):
        conv_w[i, i] = center
    conv_b = np.zeros((C,), np.float32)
    D = C * H * W
    dense_w = np.ones((num_classes, D), np.float32) / D
    dense_b = np.zeros((num_classes,), np.float32)
    return dict(
        conv1_w=jnp.asarray(conv_w), conv1_b=jnp.asarray(conv_b),
        conv2_w=jnp.asarray(conv_w.copy()), conv2_b=jnp.asarray(conv_b.copy()),
        dense_w=jnp.asarray(dense_w), dense_b=jnp.asarray(dense_b),
    )


def reference_forward(x, params):
    """Pure-JAX reference (mirrors the PyTorch forward) for a correctness check."""
    def conv(inp, w, b):
        xp = jnp.pad(inp, ((0, 0), (0, 0), (PAD, PAD), (PAD, PAD)), mode="edge")
        y = jax.lax.conv_general_dilated(
            xp, w, window_strides=(1, 1), padding="VALID",
            dimension_numbers=("NCHW", "OIHW", "NCHW"),
            precision=jax.lax.Precision.HIGHEST)
        return jnp.maximum(y + b[None, :, None, None], 0.0)

    h1 = conv(x, params["conv1_w"], params["conv1_b"])
    h2 = conv(h1, params["conv2_w"], params["conv2_b"])
    feat = h2.reshape(h2.shape[0], -1)
    out = jnp.maximum(
        jnp.dot(feat, params["dense_w"].T, precision=jax.lax.Precision.HIGHEST)
        + params["dense_b"], 0.0)
    return out, feat


# TODO(synk): evaluation/reconstruction helpers (ssim/psnr, matplotlib plots,
# soteria gradient masking, gaussian smooth_filter, grad-noise) are not part of
# forward() and are not translated.

if __name__ == "__main__":
    num_classes = 10
    data_size = [3, 16, 16]          # [C, H, W] (small, consistent with module)
    batch = 4

    params = init_params(data_size, num_classes)
    prep = prepare_params(params, data_size, num_classes)

    key = jax.random.PRNGKey(0)
    x = jax.random.uniform(key, (batch, *data_size), dtype=jnp.float32)

    out, feature = modified_lenet_forward(x, prep, num_classes)
    jax.block_until_ready((out, feature))

    ref_out, ref_feat = reference_forward(x, params)
    assert out.shape == (batch, num_classes)
    assert feature.shape == (batch, data_size[0] * data_size[1] * data_size[2])
    assert np.allclose(np.asarray(out), np.asarray(ref_out), atol=1e-4)
    assert np.allclose(np.asarray(feature), np.asarray(ref_feat), atol=1e-4)
    print("KERNEL_OK")
</pallas_src>

<mosaic_0001>
module attributes {stable_mosaic.version = 11 : i64} {
  func.func @fused_lenet_kernel(%arg0: i32, %arg1: memref<2x16x48xf32, #tpu.memory_space<vmem>>, %arg2: memref<5x48x48xf32, #tpu.memory_space<vmem>>, %arg3: memref<1x48xf32, #tpu.memory_space<vmem>>, %arg4: memref<5x48x48xf32, #tpu.memory_space<vmem>>, %arg5: memref<1x48xf32, #tpu.memory_space<vmem>>, %arg6: memref<16x48x128xf32, #tpu.memory_space<vmem>>, %arg7: memref<1x128xf32, #tpu.memory_space<vmem>>, %arg8: memref<2x1x128xf32, #tpu.memory_space<vmem>>, %arg9: memref<2x16x48xf32, #tpu.memory_space<vmem>>, %arg10: memref<2x20x48xf32, #tpu.memory_space<vmem>>) attributes {dimension_semantics = [#tpu.dimension_semantics<parallel>], iteration_bounds = array<i64: 2>, scalar_prefetch = 0 : i64, scratch_operands = 1 : i64, tpu.core_type = #tpu.core_type<tc>, window_params = [{transform_indices = @transform_0, window_bounds = array<i64: 2, 16, 48>}, {pipeline_mode = #tpu.pipeline_mode<synchronous>, transform_indices = @transform_1, window_bounds = array<i64: 5, 48, 48>}, {pipeline_mode = #tpu.pipeline_mode<synchronous>, transform_indices = @transform_2, window_bounds = array<i64: 1, 48>}, {pipeline_mode = #tpu.pipeline_mode<synchronous>, transform_indices = @transform_3, window_bounds = array<i64: 5, 48, 48>}, {pipeline_mode = #tpu.pipeline_mode<synchronous>, transform_indices = @transform_4, window_bounds = array<i64: 1, 48>}, {pipeline_mode = #tpu.pipeline_mode<synchronous>, transform_indices = @transform_5, window_bounds = array<i64: 16, 48, 128>}, {pipeline_mode = #tpu.pipeline_mode<synchronous>, transform_indices = @transform_6, window_bounds = array<i64: 1, 128>}, {transform_indices = @transform_7, window_bounds = array<i64: 2, 1, 128>}, {transform_indices = @transform_8, window_bounds = array<i64: 2, 16, 48>}]} {
    %c0 = arith.constant 0 : index
    %c0_0 = arith.constant 0 : index
    %c0_1 = arith.constant 0 : index
    %0 = vector.load %arg1[%c0, %c0_0, %c0_1] : memref<2x16x48xf32, #tpu.memory_space<vmem>>, vector<2x16x48xf32>
    %c0_2 = arith.constant 0 : index
    %c2 = arith.constant 2 : index
    %c0_3 = arith.constant 0 : index
    %1 = vector.load %arg10[%c0_2, %c2, %c0_3] : memref<2x20x48xf32, #tpu.memory_space<vmem>>, vector<2x16x48xf32>
    tpu.vector_store %arg10[%c0_2, %c2, %c0_3], %0 {strides = array<i32>} : memref<2x20x48xf32, #tpu.memory_space<vmem>>, vector<2x16x48xf32>,
    %2 = vector.extract_strided_slice %0 {offsets = [0, 0, 0], sizes = [2, 1, 48], strides = [1, 1, 1]} : vector<2x16x48xf32> to vector<2x1x48xf32>
    %3 = vector.extract_strided_slice %0 {offsets = [0, 15, 0], sizes = [2, 1, 48], strides = [1, 1, 1]} : vector<2x16x48xf32> to vector<2x1x48xf32>
    %c0_4 = arith.constant 0 : index
    %c0_5 = arith.constant 0 : index
    %c0_6 = arith.constant 0 : index
    %4 = vector.load %arg10[%c0_4, %c0_5, %c0_6] : memref<2x20x48xf32, #tpu.memory_space<vmem>>, vector<2x1x48xf32>
    tpu.vector_store %arg10[%c0_4, %c0_5, %c0_6], %2 {strides = array<i32>} : memref<2x20x48xf32, #tpu.memory_space<vmem>>, vector<2x1x48xf32>,
    %c0_7 = arith.constant 0 : index
    %c18 = arith.constant 18 : index
    %c0_8 = arith.constant 0 : index
    %5 = vector.load %arg10[%c0_7, %c18, %c0_8] : memref<2x20x48xf32, #tpu.memory_space<vmem>>, vector<2x1x48xf32>
    tpu.vector_store %arg10[%c0_7, %c18, %c0_8], %3 {strides = array<i32>} : memref<2x20x48xf32, #tpu.memory_space<vmem>>, vector<2x1x48xf32>,
    %c0_9 = arith.constant 0 : index
    %c1 = arith.constant 1 : index
    %c0_10 = arith.constant 0 : index
    %6 = vector.load %arg10[%c0_9, %c1, %c0_10] : memref<2x20x48xf32, #tpu.memory_space<vmem>>, vector<2x1x48xf32>
    tpu.vector_store %arg10[%c0_9, %c1, %c0_10], %2 {strides = array<i32>} : memref<2x20x48xf32, #tpu.memory_space<vmem>>, vector<2x1x48xf32>,
    %c0_11 = arith.constant 0 : index
    %c19 = arith.constant 19 : index
    %c0_12 = arith.constant 0 : index
    %7 = vector.load %arg10[%c0_11, %c19, %c0_12] : memref<2x20x48xf32, #tpu.memory_space<vmem>>, vector<2x1x48xf32>
    tpu.vector_store %arg10[%c0_11, %c19, %c0_12], %3 {strides = array<i32>} : memref<2x20x48xf32, #tpu.memory_space<vmem>>, vector<2x1x48xf32>,
    %c0_13 = arith.constant 0 : index
    %c0_14 = arith.constant 0 : index
    %c0_15 = arith.constant 0 : index
    %8 = vector.load %arg10[%c0_13, %c0_14, %c0_15] : memref<2x20x48xf32, #tpu.memory_space<vmem>>, vector<2x16x48xf32>
    %9 = vector.shape_cast %8 : vector<2x16x48xf32> to vector<32x48xf32>
    %c0_16 = arith.constant 0 : index
    %c0_17 = arith.constant 0 : index
    %c0_18 = arith.constant 0 : index
    %10 = vector.load %arg2[%c0_16, %c0_17, %c0_18] : memref<5x48x48xf32, #tpu.memory_space<vmem>>, vector<1x48x48xf32>
    %11 = vector.shape_cast %10 : vector<1x48x48xf32> to vector<48x48xf32>
    %cst = arith.constant dense<0.000000e+00> : vector<32x48xf32>
    %12 = tpu.matmul %9, %11, %cst {dimension_numbers = #tpu.dot_dimension_numbers<[1], [0], [0], [1], [0, 0, 1, 1], [], []>} : vector<32x48xf32>, vector<48x48xf32>, vector<32x48xf32> -> vector<32x48xf32>
    %c0_19 = arith.constant 0 : index
    %c1_20 = arith.constant 1 : index
    %c0_21 = arith.constant 0 : index
    %13 = vector.load %arg10[%c0_19, %c1_20, %c0_21] : memref<2x20x48xf32, #tpu.memory_space<vmem>>, vector<2x16x48xf32>
    %14 = vector.shape_cast %13 : vector<2x16x48xf32> to vector<32x48xf32>
    %c1_22 = arith.constant 1 : index
    %c0_23 = arith.constant 0 : index
    %c0_24 = arith.constant 0 : index
    %15 = vector.load %arg2[%c1_22, %c0_23, %c0_24] : memref<5x48x48xf32, #tpu.memory_space<vmem>>, vector<1x48x48xf32>
    %16 = vector.shape_cast %15 : vector<1x48x48xf32> to vector<48x48xf32>
    %cst_25 = arith.constant dense<0.000000e+00> : vector<32x48xf32>
    %17 = tpu.matmul %14, %16, %cst_25 {dimension_numbers = #tpu.dot_dimension_numbers<[1], [0], [0], [1], [0, 0, 1, 1], [], []>} : vector<32x48xf32>, vector<48x48xf32>, vector<32x48xf32> -> vector<32x48xf32>
    %c0_26 = arith.constant 0 : index
    %c2_27 = arith.constant 2 : index
    %c0_28 = arith.constant 0 : index
    %18 = vector.load %arg10[%c0_26, %c2_27, %c0_28] : memref<2x20x48xf32, #tpu.memory_space<vmem>>, vector<2x16x48xf32>
    %19 = vector.shape_cast %18 : vector<2x16x48xf32> to vector<32x48xf32>
    %c2_29 = arith.constant 2 : index
    %c0_30 = arith.constant 0 : index
    %c0_31 = arith.constant 0 : index
    %20 = vector.load %arg2[%c2_29, %c0_30, %c0_31] : memref<5x48x48xf32, #tpu.memory_space<vmem>>, vector<1x48x48xf32>
    %21 = vector.shape_cast %20 : vector<1x48x48xf32> to vector<48x48xf32>
    %cst_32 = arith.constant dense<0.000000e+00> : vector<32x48xf32>
    %22 = tpu.matmul %19, %21, %cst_32 {dimension_numbers = #tpu.dot_dimension_numbers<[1], [0], [0], [1], [0, 0, 1, 1], [], []>} : vector<32x48xf32>, vector<48x48xf32>, vector<32x48xf32> -> vector<32x48xf32>
    %c0_33 = arith.constant 0 : index
    %c3 = arith.constant 3 : index
    %c0_34 = arith.constant 0 : index
    %23 = vector.load %arg10[%c0_33, %c3, %c0_34] : memref<2x20x48xf32, #tpu.memory_space<vmem>>, vector<2x16x48xf32>
    %24 = vector.shape_cast %23 : vector<2x16x48xf32> to vector<32x48xf32>
    %c3_35 = arith.constant 3 : index
    %c0_36 = arith.constant 0 : index
    %c0_37 = arith.constant 0 : index
    %25 = vector.load %arg2[%c3_35, %c0_36, %c0_37] : memref<5x48x48xf32, #tpu.memory_space<vmem>>, vector<1x48x48xf32>
    %26 = vector.shape_cast %25 : vector<1x48x48xf32> to vector<48x48xf32>
    %cst_38 = arith.constant dense<0.000000e+00> : vector<32x48xf32>
    %27 = tpu.matmul %24, %26, %cst_38 {dimension_numbers = #tpu.dot_dimension_numbers<[1], [0], [0], [1], [0, 0, 1, 1], [], []>} : vector<32x48xf32>, vector<48x48xf32>, vector<32x48xf32> -> vector<32x48xf32>
    %c0_39 = arith.constant 0 : index
    %c4 = arith.constant 4 : index
    %c0_40 = arith.constant 0 : index
    %28 = vector.load %arg10[%c0_39, %c4, %c0_40] : memref<2x20x48xf32, #tpu.memory_space<vmem>>, vector<2x16x48xf32>
    %29 = vector.shape_cast %28 : vector<2x16x48xf32> to vector<32x48xf32>
    %c4_41 = arith.constant 4 : index
    %c0_42 = arith.constant 0 : index
    %c0_43 = arith.constant 0 : index
    %30 = vector.load %arg2[%c4_41, %c0_42, %c0_43] : memref<5x48x48xf32, #tpu.memory_space<vmem>>, vector<1x48x48xf32>
    %31 = vector.shape_cast %30 : vector<1x48x48xf32> to vector<48x48xf32>
    %cst_44 = arith.constant dense<0.000000e+00> : vector<32x48xf32>
    %32 = tpu.matmul %29, %31, %cst_44 {dimension_numbers = #tpu.dot_dimension_numbers<[1], [0], [0], [1], [0, 0, 1, 1], [], []>} : vector<32x48xf32>, vector<48x48xf32>, vector<32x48xf32> -> vector<32x48xf32>
    %33 = arith.addf %12, %17 : vector<32x48xf32>
    %34 = arith.addf %22, %27 : vector<32x48xf32>
    %35 = arith.addf %33, %34 : vector<32x48xf32>
    %36 = arith.addf %35, %32 : vector<32x48xf32>
    %c0_45 = arith.constant 0 : index
    %c0_46 = arith.constant 0 : index
    %37 = vector.load %arg3[%c0_45, %c0_46] : memref<1x48xf32, #tpu.memory_space<vmem>>, vector<1x48xf32>
    %38 = vector.broadcast %37 : vector<1x48xf32> to vector<32x48xf32>
    %39 = arith.addf %36, %38 : vector<32x48xf32>
    %cst_47 = arith.constant 0.000000e+00 : f32
    %40 = vector.broadcast %cst_47 : f32 to vector<32x48xf32>
    %41 = arith.maximumf %39, %40 : vector<32x48xf32>
    %42 = vector.shape_cast %41 : vector<32x48xf32> to vector<2x16x48xf32>
    %c0_48 = arith.constant 0 : index
    %c2_49 = arith.constant 2 : index
    %c0_50 = arith.constant 0 : index
    %43 = vector.load %arg10[%c0_48, %c2_49, %c0_50] : memref<2x20x48xf32, #tpu.memory_space<vmem>>, vector<2x16x48xf32>
    tpu.vector_store %arg10[%c0_48, %c2_49, %c0_50], %42 {strides = array<i32>} : memref<2x20x48xf32, #tpu.memory_space<vmem>>, vector<2x16x48xf32>,
    %44 = vector.extract_strided_slice %42 {offsets = [0, 0, 0], sizes = [2, 1, 48], strides = [1, 1, 1]} : vector<2x16x48xf32> to vector<2x1x48xf32>
    %45 = vector.extract_strided_slice %42 {offsets = [0, 15, 0], sizes = [2, 1, 48], strides = [1, 1, 1]} : vector<2x16x48xf32> to vector<2x1x48xf32>
    %c0_51 = arith.constant 0 : index
    %c0_52 = arith.constant 0 : index
    %c0_53 = arith.constant 0 : index
    %46 = vector.load %arg10[%c0_51, %c0_52, %c0_53] : memref<2x20x48xf32, #tpu.memory_space<vmem>>, vector<2x1x48xf32>
    tpu.vector_store %arg10[%c0_51, %c0_52, %c0_53], %44 {strides = array<i32>} : memref<2x20x48xf32, #tpu.memory_space<vmem>>, vector<2x1x48xf32>,
    %c0_54 = arith.constant 0 : index
    %c18_55 = arith.constant 18 : index
    %c0_56 = arith.constant 0 : index
    %47 = vector.load %arg10[%c0_54, %c18_55, %c0_56] : memref<2x20x48xf32, #tpu.memory_space<vmem>>, vector<2x1x48xf32>
    tpu.vector_store %arg10[%c0_54, %c18_55, %c0_56], %45 {strides = array<i32>} : memref<2x20x48xf32, #tpu.memory_space<vmem>>, vector<2x1x48xf32>,
    %c0_57 = arith.constant 0 : index
    %c1_58 = arith.constant 1 : index
    %c0_59 = arith.constant 0 : index
    %48 = vector.load %arg10[%c0_57, %c1_58, %c0_59] : memref<2x20x48xf32, #tpu.memory_space<vmem>>, vector<2x1x48xf32>
    tpu.vector_store %arg10[%c0_57, %c1_58, %c0_59], %44 {strides = array<i32>} : memref<2x20x48xf32, #tpu.memory_space<vmem>>, vector<2x1x48xf32>,
    %c0_60 = arith.constant 0 : index
    %c19_61 = arith.constant 19 : index
    %c0_62 = arith.constant 0 : index
    %49 = vector.load %arg10[%c0_60, %c19_61, %c0_62] : memref<2x20x48xf32, #tpu.memory_space<vmem>>, vector<2x1x48xf32>
    tpu.vector_store %arg10[%c0_60, %c19_61, %c0_62], %45 {strides = array<i32>} : memref<2x20x48xf32, #tpu.memory_space<vmem>>, vector<2x1x48xf32>,
    %c0_63 = arith.constant 0 : index
    %c0_64 = arith.constant 0 : index
    %c0_65 = arith.constant 0 : index
    %50 = vector.load %arg10[%c0_63, %c0_64, %c0_65] : memref<2x20x48xf32, #tpu.memory_space<vmem>>, vector<2x16x48xf32>
    %51 = vector.shape_cast %50 : vector<2x16x48xf32> to vector<32x48xf32>
    %c0_66 = arith.constant 0 : index
    %c0_67 = arith.constant 0 : index
    %c0_68 = arith.constant 0 : index
    %52 = vector.load %arg4[%c0_66, %c0_67, %c0_68] : memref<5x48x48xf32, #tpu.memory_space<vmem>>, vector<1x48x48xf32>
    %53 = vector.shape_cast %52 : vector<1x48x48xf32> to vector<48x48xf32>
    %cst_69 = arith.constant dense<0.000000e+00> : vector<32x48xf32>
    %54 = tpu.matmul %51, %53, %cst_69 {dimension_numbers = #tpu.dot_dimension_numbers<[1], [0], [0], [1], [0, 0, 1, 1], [], []>} : vector<32x48xf32>, vector<48x48xf32>, vector<32x48xf32> -> vector<32x48xf32>
    %c0_70 = arith.constant 0 : index
    %c1_71 = arith.constant 1 : index
    %c0_72 = arith.constant 0 : index
    %55 = vector.load %arg10[%c0_70, %c1_71, %c0_72] : memref<2x20x48xf32, #tpu.memory_space<vmem>>, vector<2x16x48xf32>
    %56 = vector.shape_cast %55 : vector<2x16x48xf32> to vector<32x48xf32>
    %c1_73 = arith.constant 1 : index
    %c0_74 = arith.constant 0 : index
    %c0_75 = arith.constant 0 : index
    %57 = vector.load %arg4[%c1_73, %c0_74, %c0_75] : memref<5x48x48xf32, #tpu.memory_space<vmem>>, vector<1x48x48xf32>
    %58 = vector.shape_cast %57 : vector<1x48x48xf32> to vector<48x48xf32>
    %cst_76 = arith.constant dense<0.000000e+00> : vector<32x48xf32>
    %59 = tpu.matmul %56, %58, %cst_76 {dimension_numbers = #tpu.dot_dimension_numbers<[1], [0], [0], [1], [0, 0, 1, 1], [], []>} : vector<32x48xf32>, vector<48x48xf32>, vector<32x48xf32> -> vector<32x48xf32>
    %c0_77 = arith.constant 0 : index
    %c2_78 = arith.constant 2 : index
    %c0_79 = arith.constant 0 : index
    %60 = vector.load %arg10[%c0_77, %c2_78, %c0_79] : memref<2x20x48xf32, #tpu.memory_space<vmem>>, vector<2x16x48xf32>
    %61 = vector.shape_cast %60 : vector<2x16x48xf32> to vector<32x48xf32>
    %c2_80 = arith.constant 2 : index
    %c0_81 = arith.constant 0 : index
    %c0_82 = arith.constant 0 : index
    %62 = vector.load %arg4[%c2_80, %c0_81, %c0_82] : memref<5x48x48xf32, #tpu.memory_space<vmem>>, vector<1x48x48xf32>
    %63 = vector.shape_cast %62 : vector<1x48x48xf32> to vector<48x48xf32>
    %cst_83 = arith.constant dense<0.000000e+00> : vector<32x48xf32>
    %64 = tpu.matmul %61, %63, %cst_83 {dimension_numbers = #tpu.dot_dimension_numbers<[1], [0], [0], [1], [0, 0, 1, 1], [], []>} : vector<32x48xf32>, vector<48x48xf32>, vector<32x48xf32> -> vector<32x48xf32>
    %c0_84 = arith.constant 0 : index
    %c3_85 = arith.constant 3 : index
    %c0_86 = arith.constant 0 : index
    %65 = vector.load %arg10[%c0_84, %c3_85, %c0_86] : memref<2x20x48xf32, #tpu.memory_space<vmem>>, vector<2x16x48xf32>
    %66 = vector.shape_cast %65 : vector<2x16x48xf32> to vector<32x48xf32>
    %c3_87 = arith.constant 3 : index
    %c0_88 = arith.constant 0 : index
    %c0_89 = arith.constant 0 : index
    %67 = vector.load %arg4[%c3_87, %c0_88, %c0_89] : memref<5x48x48xf32, #tpu.memory_space<vmem>>, vector<1x48x48xf32>
    %68 = vector.shape_cast %67 : vector<1x48x48xf32> to vector<48x48xf32>
    %cst_90 = arith.constant dense<0.000000e+00> : vector<32x48xf32>
    %69 = tpu.matmul %66, %68, %cst_90 {dimension_numbers = #tpu.dot_dimension_numbers<[1], [0], [0], [1], [0, 0, 1, 1], [], []>} : vector<32x48xf32>, vector<48x48xf32>, vector<32x48xf32> -> vector<32x48xf32>
    %c0_91 = arith.constant 0 : index
    %c4_92 = arith.constant 4 : index
    %c0_93 = arith.constant 0 : index
    %70 = vector.load %arg10[%c0_91, %c4_92, %c0_93] : memref<2x20x48xf32, #tpu.memory_space<vmem>>, vector<2x16x48xf32>
    %71 = vector.shape_cast %70 : vector<2x16x48xf32> to vector<32x48xf32>
    %c4_94 = arith.constant 4 : index
    %c0_95 = arith.constant 0 : index
    %c0_96 = arith.constant 0 : index
    %72 = vector.load %arg4[%c4_94, %c0_95, %c0_96] : memref<5x48x48xf32, #tpu.memory_space<vmem>>, vector<1x48x48xf32>
    %73 = vector.shape_cast %72 : vector<1x48x48xf32> to vector<48x48xf32>
    %cst_97 = arith.constant dense<0.000000e+00> : vector<32x48xf32>
    %74 = tpu.matmul %71, %73, %cst_97 {dimension_numbers = #tpu.dot_dimension_numbers<[1], [0], [0], [1], [0, 0, 1, 1], [], []>} : vector<32x48xf32>, vector<48x48xf32>, vector<32x48xf32> -> vector<32x48xf32>
    %75 = arith.addf %54, %59 : vector<32x48xf32>
    %76 = arith.addf %64, %69 : vector<32x48xf32>
    %77 = arith.addf %75, %76 : vector<32x48xf32>
    %78 = arith.addf %77, %74 : vector<32x48xf32>
    %c0_98 = arith.constant 0 : index
    %c0_99 = arith.constant 0 : index
    %79 = vector.load %arg5[%c0_98, %c0_99] : memref<1x48xf32, #tpu.memory_space<vmem>>, vector<1x48xf32>
    %80 = vector.broadcast %79 : vector<1x48xf32> to vector<32x48xf32>
    %81 = arith.addf %78, %80 : vector<32x48xf32>
    %cst_100 = arith.constant 0.000000e+00 : f32
    %82 = vector.broadcast %cst_100 : f32 to vector<32x48xf32>
    %83 = arith.maximumf %81, %82 : vector<32x48xf32>
    %84 = vector.shape_cast %83 : vector<32x48xf32> to vector<2x16x48xf32>
    %c0_101 = arith.constant 0 : index
    %c0_102 = arith.constant 0 : index
    %c0_103 = arith.constant 0 : index
    %85 = vector.load %arg9[%c0_101, %c0_102, %c0_103] : memref<2x16x48xf32, #tpu.memory_space<vmem>>, vector<2x16x48xf32>
    tpu.vector_store %arg9[%c0_101, %c0_102, %c0_103], %84 {strides = array<i32>} : memref<2x16x48xf32, #tpu.memory_space<vmem>>, vector<2x16x48xf32>,
    %86 = vector.extract_strided_slice %84 {offsets = [0, 0, 0], sizes = [2, 1, 48], strides = [1, 1, 1]} : vector<2x16x48xf32> to vector<2x1x48xf32>
    %87 = vector.shape_cast %86 : vector<2x1x48xf32> to vector<2x48xf32>
    %c0_104 = arith.constant 0 : index
    %c0_105 = arith.constant 0 : index
    %c0_106 = arith.constant 0 : index
    %88 = vector.load %arg6[%c0_104, %c0_105, %c0_106] : memref<16x48x128xf32, #tpu.memory_space<vmem>>, vector<1x48x128xf32>
    %89 = vector.shape_cast %88 : vector<1x48x128xf32> to vector<48x128xf32>
    %cst_107 = arith.constant dense<0.000000e+00> : vector<2x128xf32>
    %90 = tpu.matmul %87, %89, %cst_107 {dimension_numbers = #tpu.dot_dimension_numbers<[1], [0], [0], [1], [0, 0, 1, 1], [], []>} : vector<2x48xf32>, vector<48x128xf32>, vector<2x128xf32> -> vector<2x128xf32>
    %91 = vector.extract_strided_slice %84 {offsets = [0, 1, 0], sizes = [2, 1, 48], strides = [1, 1, 1]} : vector<2x16x48xf32> to vector<2x1x48xf32>
    %92 = vector.shape_cast %91 : vector<2x1x48xf32> to vector<2x48xf32>
    %c1_108 = arith.constant 1 : index
    %c0_109 = arith.constant 0 : index
    %c0_110 = arith.constant 0 : index
    %93 = vector.load %arg6[%c1_108, %c0_109, %c0_110] : memref<16x48x128xf32, #tpu.memory_space<vmem>>, vector<1x48x128xf32>
    %94 = vector.shape_cast %93 : vector<1x48x128xf32> to vector<48x128xf32>
    %cst_111 = arith.constant dense<0.000000e+00> : vector<2x128xf32>
    %95 = tpu.matmul %92, %94, %cst_111 {dimension_numbers = #tpu.dot_dimension_numbers<[1], [0], [0], [1], [0, 0, 1, 1], [], []>} : vector<2x48xf32>, vector<48x128xf32>, vector<2x128xf32> -> vector<2x128xf32>
    %96 = vector.extract_strided_slice %84 {offsets = [0, 2, 0], sizes = [2, 1, 48], strides = [1, 1, 1]} : vector<2x16x48xf32> to vector<2x1x48xf32>
    %97 = vector.shape_cast %96 : vector<2x1x48xf32> to vector<2x48xf32>
    %c2_112 = arith.constant 2 : index
    %c0_113 = arith.constant 0 : index
    %c0_114 = arith.constant 0 : index
    %98 = vector.load %arg6[%c2_112, %c0_113, %c0_114] : memref<16x48x128xf32, #tpu.memory_space<vmem>>, vector<1x48x128xf32>
    %99 = vector.shape_cast %98 : vector<1x48x128xf32> to vector<48x128xf32>
    %cst_115 = arith.constant dense<0.000000e+00> : vector<2x128xf32>
    %100 = tpu.matmul %97, %99, %cst_115 {dimension_numbers = #tpu.dot_dimension_numbers<[1], [0], [0], [1], [0, 0, 1, 1], [], []>} : vector<2x48xf32>, vector<48x128xf32>, vector<2x128xf32> -> vector<2x128xf32>
    %101 = vector.extract_strided_slice %84 {offsets = [0, 3, 0], sizes = [2, 1, 48], strides = [1, 1, 1]} : vector<2x16x48xf32> to vector<2x1x48xf32>
    %102 = vector.shape_cast %101 : vector<2x1x48xf32> to vector<2x48xf32>
    %c3_116 = arith.constant 3 : index
    %c0_117 = arith.constant 0 : index
    %c0_118 = arith.constant 0 : index
    %103 = vector.load %arg6[%c3_116, %c0_117, %c0_118] : memref<16x48x128xf32, #tpu.memory_space<vmem>>, vector<1x48x128xf32>
    %104 = vector.shape_cast %103 : vector<1x48x128xf32> to vector<48x128xf32>
    %cst_119 = arith.constant dense<0.000000e+00> : vector<2x128xf32>
    %105 = tpu.matmul %102, %104, %cst_119 {dimension_numbers = #tpu.dot_dimension_numbers<[1], [0], [0], [1], [0, 0, 1, 1], [], []>} : vector<2x48xf32>, vector<48x128xf32>, vector<2x128xf32> -> vector<2x128xf32>
    %106 = vector.extract_strided_slice %84 {offsets = [0, 4, 0], sizes = [2, 1, 48], strides = [1, 1, 1]} : vector<2x16x48xf32> to vector<2x1x48xf32>
    %107 = vector.shape_cast %106 : vector<2x1x48xf32> to vector<2x48xf32>
    %c4_120 = arith.constant 4 : index
    %c0_121 = arith.constant 0 : index
    %c0_122 = arith.constant 0 : index
    %108 = vector.load %arg6[%c4_120, %c0_121, %c0_122] : memref<16x48x128xf32, #tpu.memory_space<vmem>>, vector<1x48x128xf32>
    %109 = vector.shape_cast %108 : vector<1x48x128xf32> to vector<48x128xf32>
    %cst_123 = arith.constant dense<0.000000e+00> : vector<2x128xf32>
    %110 = tpu.matmul %107, %109, %cst_123 {dimension_numbers = #tpu.dot_dimension_numbers<[1], [0], [0], [1], [0, 0, 1, 1], [], []>} : vector<2x48xf32>, vector<48x128xf32>, vector<2x128xf32> -> vector<2x128xf32>
    %111 = vector.extract_strided_slice %84 {offsets = [0, 5, 0], sizes = [2, 1, 48], strides = [1, 1, 1]} : vector<2x16x48xf32> to vector<2x1x48xf32>
    %112 = vector.shape_cast %111 : vector<2x1x48xf32> to vector<2x48xf32>
    %c5 = arith.constant 5 : index
    %c0_124 = arith.constant 0 : index
    %c0_125 = arith.constant 0 : index
    %113 = vector.load %arg6[%c5, %c0_124, %c0_125] : memref<16x48x128xf32, #tpu.memory_space<vmem>>, vector<1x48x128xf32>
    %114 = vector.shape_cast %113 : vector<1x48x128xf32> to vector<48x128xf32>
    %cst_126 = arith.constant dense<0.000000e+00> : vector<2x128xf32>
    %115 = tpu.matmul %112, %114, %cst_126 {dimension_numbers = #tpu.dot_dimension_numbers<[1], [0], [0], [1], [0, 0, 1, 1], [], []>} : vector<2x48xf32>, vector<48x128xf32>, vector<2x128xf32> -> vector<2x128xf32>
    %116 = vector.extract_strided_slice %84 {offsets = [0, 6, 0], sizes = [2, 1, 48], strides = [1, 1, 1]} : vector<2x16x48xf32> to vector<2x1x48xf32>
    %117 = vector.shape_cast %116 : vector<2x1x48xf32> to vector<2x48xf32>
    %c6 = arith.constant 6 : index
    %c0_127 = arith.constant 0 : index
    %c0_128 = arith.constant 0 : index
    %118 = vector.load %arg6[%c6, %c0_127, %c0_128] : memref<16x48x128xf32, #tpu.memory_space<vmem>>, vector<1x48x128xf32>
    %119 = vector.shape_cast %118 : vector<1x48x128xf32> to vector<48x128xf32>
    %cst_129 = arith.constant dense<0.000000e+00> : vector<2x128xf32>
    %120 = tpu.matmul %117, %119, %cst_129 {dimension_numbers = #tpu.dot_dimension_numbers<[1], [0], [0], [1], [0, 0, 1, 1], [], []>} : vector<2x48xf32>, vector<48x128xf32>, vector<2x128xf32> -> vector<2x128xf32>
    %121 = vector.extract_strided_slice %84 {offsets = [0, 7, 0], sizes = [2, 1, 48], strides = [1, 1, 1]} : vector<2x16x48xf32> to vector<2x1x48xf32>
    %122 = vector.shape_cast %121 : vector<2x1x48xf32> to vector<2x48xf32>
    %c7 = arith.constant 7 : index
    %c0_130 = arith.constant 0 : index
    %c0_131 = arith.constant 0 : index
    %123 = vector.load %arg6[%c7, %c0_130, %c0_131] : memref<16x48x128xf32, #tpu.memory_space<vmem>>, vector<1x48x128xf32>
    %124 = vector.shape_cast %123 : vector<1x48x128xf32> to vector<48x128xf32>
    %cst_132 = arith.constant dense<0.000000e+00> : vector<2x128xf32>
    %125 = tpu.matmul %122, %124, %cst_132 {dimension_numbers = #tpu.dot_dimension_numbers<[1], [0], [0], [1], [0, 0, 1, 1], [], []>} : vector<2x48xf32>, vector<48x128xf32>, vector<2x128xf32> -> vector<2x128xf32>
    %126 = vector.extract_strided_slice %84 {offsets = [0, 8, 0], sizes = [2, 1, 48], strides = [1, 1, 1]} : vector<2x16x48xf32> to vector<2x1x48xf32>
    %127 = vector.shape_cast %126 : vector<2x1x48xf32> to vector<2x48xf32>
    %c8 = arith.constant 8 : index
    %c0_133 = arith.constant 0 : index
    %c0_134 = arith.constant 0 : index
    %128 = vector.load %arg6[%c8, %c0_133, %c0_134] : memref<16x48x128xf32, #tpu.memory_space<vmem>>, vector<1x48x128xf32>
    %129 = vector.shape_cast %128 : vector<1x48x128xf32> to vector<48x128xf32>
    %cst_135 = arith.constant dense<0.000000e+00> : vector<2x128xf32>
    %130 = tpu.matmul %127, %129, %cst_135 {dimension_numbers = #tpu.dot_dimension_numbers<[1], [0], [0], [1], [0, 0, 1, 1], [], []>} : vector<2x48xf32>, vector<48x128xf32>, vector<2x128xf32> -> vector<2x128xf32>
    %131 = vector.extract_strided_slice %84 {offsets = [0, 9, 0], sizes = [2, 1, 48], strides = [1, 1, 1]} : vector<2x16x48xf32> to vector<2x1x48xf32>
    %132 = vector.shape_cast %131 : vector<2x1x48xf32> to vector<2x48xf32>
    %c9 = arith.constant 9 : index
    %c0_136 = arith.constant 0 : index
    %c0_137 = arith.constant 0 : index
    %133 = vector.load %arg6[%c9, %c0_136, %c0_137] : memref<16x48x128xf32, #tpu.memory_space<vmem>>, vector<1x48x128xf32>
    %134 = vector.shape_cast %133 : vector<1x48x128xf32> to vector<48x128xf32>
    %cst_138 = arith.constant dense<0.000000e+00> : vector<2x128xf32>
    %135 = tpu.matmul %132, %134, %cst_138 {dimension_numbers = #tpu.dot_dimension_numbers<[1], [0], [0], [1], [0, 0, 1, 1], [], []>} : vector<2x48xf32>, vector<48x128xf32>, vector<2x128xf32> -> vector<2x128xf32>
    %136 = vector.extract_strided_slice %84 {offsets = [0, 10, 0], sizes = [2, 1, 48], strides = [1, 1, 1]} : vector<2x16x48xf32> to vector<2x1x48xf32>
    %137 = vector.shape_cast %136 : vector<2x1x48xf32> to vector<2x48xf32>
    %c10 = arith.constant 10 : index
    %c0_139 = arith.constant 0 : index
    %c0_140 = arith.constant 0 : index
    %138 = vector.load %arg6[%c10, %c0_139, %c0_140] : memref<16x48x128xf32, #tpu.memory_space<vmem>>, vector<1x48x128xf32>
    %139 = vector.shape_cast %138 : vector<1x48x128xf32> to vector<48x128xf32>
    %cst_141 = arith.constant dense<0.000000e+00> : vector<2x128xf32>
    %140 = tpu.matmul %137, %139, %cst_141 {dimension_numbers = #tpu.dot_dimension_numbers<[1], [0], [0], [1], [0, 0, 1, 1], [], []>} : vector<2x48xf32>, vector<48x128xf32>, vector<2x128xf32> -> vector<2x128xf32>
    %141 = vector.extract_strided_slice %84 {offsets = [0, 11, 0], sizes = [2, 1, 48], strides = [1, 1, 1]} : vector<2x16x48xf32> to vector<2x1x48xf32>
    %142 = vector.shape_cast %141 : vector<2x1x48xf32> to vector<2x48xf32>
    %c11 = arith.constant 11 : index
    %c0_142 = arith.constant 0 : index
    %c0_143 = arith.constant 0 : index
    %143 = vector.load %arg6[%c11, %c0_142, %c0_143] : memref<16x48x128xf32, #tpu.memory_space<vmem>>, vector<1x48x128xf32>
    %144 = vector.shape_cast %143 : vector<1x48x128xf32> to vector<48x128xf32>
    %cst_144 = arith.constant dense<0.000000e+00> : vector<2x128xf32>
    %145 = tpu.matmul %142, %144, %cst_144 {dimension_numbers = #tpu.dot_dimension_numbers<[1], [0], [0], [1], [0, 0, 1, 1], [], []>} : vector<2x48xf32>, vector<48x128xf32>, vector<2x128xf32> -> vector<2x128xf32>
    %146 = vector.extract_strided_slice %84 {offsets = [0, 12, 0], sizes = [2, 1, 48], strides = [1, 1, 1]} : vector<2x16x48xf32> to vector<2x1x48xf32>
    %147 = vector.shape_cast %146 : vector<2x1x48xf32> to vector<2x48xf32>
    %c12 = arith.constant 12 : index
    %c0_145 = arith.constant 0 : index
    %c0_146 = arith.constant 0 : index
    %148 = vector.load %arg6[%c12, %c0_145, %c0_146] : memref<16x48x128xf32, #tpu.memory_space<vmem>>, vector<1x48x128xf32>
    %149 = vector.shape_cast %148 : vector<1x48x128xf32> to vector<48x128xf32>
    %cst_147 = arith.constant dense<0.000000e+00> : vector<2x128xf32>
    %150 = tpu.matmul %147, %149, %cst_147 {dimension_numbers = #tpu.dot_dimension_numbers<[1], [0], [0], [1], [0, 0, 1, 1], [], []>} : vector<2x48xf32>, vector<48x128xf32>, vector<2x128xf32> -> vector<2x128xf32>
    %151 = vector.extract_strided_slice %84 {offsets = [0, 13, 0], sizes = [2, 1, 48], strides = [1, 1, 1]} : vector<2x16x48xf32> to vector<2x1x48xf32>
    %152 = vector.shape_cast %151 : vector<2x1x48xf32> to vector<2x48xf32>
    %c13 = arith.constant 13 : index
    %c0_148 = arith.constant 0 : index
    %c0_149 = arith.constant 0 : index
    %153 = vector.load %arg6[%c13, %c0_148, %c0_149] : memref<16x48x128xf32, #tpu.memory_space<vmem>>, vector<1x48x128xf32>
    %154 = vector.shape_cast %153 : vector<1x48x128xf32> to vector<48x128xf32>
    %cst_150 = arith.constant dense<0.000000e+00> : vector<2x128xf32>
    %155 = tpu.matmul %152, %154, %cst_150 {dimension_numbers = #tpu.dot_dimension_numbers<[1], [0], [0], [1], [0, 0, 1, 1], [], []>} : vector<2x48xf32>, vector<48x128xf32>, vector<2x128xf32> -> vector<2x128xf32>
    %156 = vector.extract_strided_slice %84 {offsets = [0, 14, 0], sizes = [2, 1, 48], strides = [1, 1, 1]} : vector<2x16x48xf32> to vector<2x1x48xf32>
    %157 = vector.shape_cast %156 : vector<2x1x48xf32> to vector<2x48xf32>
    %c14 = arith.constant 14 : index
    %c0_151 = arith.constant 0 : index
    %c0_152 = arith.constant 0 : index
    %158 = vector.load %arg6[%c14, %c0_151, %c0_152] : memref<16x48x128xf32, #tpu.memory_space<vmem>>, vector<1x48x128xf32>
    %159 = vector.shape_cast %158 : vector<1x48x128xf32> to vector<48x128xf32>
    %cst_153 = arith.constant dense<0.000000e+00> : vector<2x128xf32>
    %160 = tpu.matmul %157, %159, %cst_153 {dimension_numbers = #tpu.dot_dimension_numbers<[1], [0], [0], [1], [0, 0, 1, 1], [], []>} : vector<2x48xf32>, vector<48x128xf32>, vector<2x128xf32> -> vector<2x128xf32>
    %161 = vector.extract_strided_slice %84 {offsets = [0, 15, 0], sizes = [2, 1, 48], strides = [1, 1, 1]} : vector<2x16x48xf32> to vector<2x1x48xf32>
    %162 = vector.shape_cast %161 : vector<2x1x48xf32> to vector<2x48xf32>
    %c15 = arith.constant 15 : index
    %c0_154 = arith.constant 0 : index
    %c0_155 = arith.constant 0 : index
    %163 = vector.load %arg6[%c15, %c0_154, %c0_155] : memref<16x48x128xf32, #tpu.memory_space<vmem>>, vector<1x48x128xf32>
    %164 = vector.shape_cast %163 : vector<1x48x128xf32> to vector<48x128xf32>
    %cst_156 = arith.constant dense<0.000000e+00> : vector<2x128xf32>
    %165 = tpu.matmul %162, %164, %cst_156 {dimension_numbers = #tpu.dot_dimension_numbers<[1], [0], [0], [1], [0, 0, 1, 1], [], []>} : vector<2x48xf32>, vector<48x128xf32>, vector<2x128xf32> -> vector<2x128xf32>
    %166 = arith.addf %90, %95 : vector<2x128xf32>
    %167 = arith.addf %100, %105 : vector<2x128xf32>
    %168 = arith.addf %110, %115 : vector<2x128xf32>
    %169 = arith.addf %120, %125 : vector<2x128xf32>
    %170 = arith.addf %130, %135 : vector<2x128xf32>
    %171 = arith.addf %140, %145 : vector<2x128xf32>
    %172 = arith.addf %150, %155 : vector<2x128xf32>
    %173 = arith.addf %160, %165 : vector<2x128xf32>
    %174 = arith.addf %166, %167 : vector<2x128xf32>
    %175 = arith.addf %168, %169 : vector<2x128xf32>
    %176 = arith.addf %170, %171 : vector<2x128xf32>
    %177 = arith.addf %172, %173 : vector<2x128xf32>
    %178 = arith.addf %174, %175 : vector<2x128xf32>
    %179 = arith.addf %176, %177 : vector<2x128xf32>
    %180 = arith.addf %178, %179 : vector<2x128xf32>
    %c0_157 = arith.constant 0 : index
    %c0_158 = arith.constant 0 : index
    %181 = vector.load %arg7[%c0_157, %c0_158] : memref<1x128xf32, #tpu.memory_space<vmem>>, vector<1x128xf32>
    %182 = vector.broadcast %181 : vector<1x128xf32> to vector<2x128xf32>
    %183 = arith.addf %180, %182 : vector<2x128xf32>
    %cst_159 = arith.constant 0.000000e+00 : f32
    %184 = vector.broadcast %cst_159 : f32 to vector<2x128xf32>
    %185 = arith.maximumf %183, %184 : vector<2x128xf32>
    %c0_160 = arith.constant 0 : index
    %c0_161 = arith.constant 0 : index
    %c0_162 = arith.constant 0 : index
    %186 = vector.load %arg8[%c0_160, %c0_161, %c0_162] : memref<2x1x128xf32, #tpu.memory_space<vmem>>, vector<2x1x128xf32>
    %187 = vector.shape_cast %186 : vector<2x1x128xf32> to vector<2x128xf32>
    %188 = vector.shape_cast %185 : vector<2x128xf32> to vector<2x1x128xf32>
    tpu.vector_store %arg8[%c0_160, %c0_161, %c0_162], %188 {strides = array<i32>} : memref<2x1x128xf32, #tpu.memory_space<vmem>>, vector<2x1x128xf32>,
    return
  }
  func.func @transform_0(%arg0: i32) -> (i32, i32, i32) {
    %c0_i32 = arith.constant 0 : i32
    %c0_i32_0 = arith.constant 0 : i32
    %c0_i32_1 = arith.constant 0 : i32
    return %arg0, %c0_i32, %c0_i32_0 : i32, i32, i32
  }
  func.func @transform_1(%arg0: i32) -> (i32, i32, i32) {
    %c0_i32 = arith.constant 0 : i32
    %c0_i32_0 = arith.constant 0 : i32
    %c0_i32_1 = arith.constant 0 : i32
    %c0_i32_2 = arith.constant 0 : i32
    return %c0_i32, %c0_i32_0, %c0_i32_1 : i32, i32, i32
  }
  func.func @transform_2(%arg0: i32) -> (i32, i32) {
    %c0_i32 = arith.constant 0 : i32
    %c0_i32_0 = arith.constant 0 : i32
    %c0_i32_1 = arith.constant 0 : i32
    return %c0_i32, %c0_i32_0 : i32, i32
  }
  func.func @transform_3(%arg0: i32) -> (i32, i32, i32) {
    %c0_i32 = arith.constant 0 : i32
    %c0_i32_0 = arith.constant 0 : i32
    %c0_i32_1 = arith.constant 0 : i32
    %c0_i32_2 = arith.constant 0 : i32
    return %c0_i32, %c0_i32_0, %c0_i32_1 : i32, i32, i32
  }
  func.func @transform_4(%arg0: i32) -> (i32, i32) {
    %c0_i32 = arith.constant 0 : i32
    %c0_i32_0 = arith.constant 0 : i32
    %c0_i32_1 = arith.constant 0 : i32
    return %c0_i32, %c0_i32_0 : i32, i32
  }
  func.func @transform_5(%arg0: i32) -> (i32, i32, i32) {
    %c0_i32 = arith.constant 0 : i32
    %c0_i32_0 = arith.constant 0 : i32
    %c0_i32_1 = arith.constant 0 : i32
    %c0_i32_2 = arith.constant 0 : i32
    return %c0_i32, %c0_i32_0, %c0_i32_1 : i32, i32, i32
  }
  func.func @transform_6(%arg0: i32) -> (i32, i32) {
    %c0_i32 = arith.constant 0 : i32
    %c0_i32_0 = arith.constant 0 : i32
    %c0_i32_1 = arith.constant 0 : i32
    return %c0_i32, %c0_i32_0 : i32, i32
  }
  func.func @transform_7(%arg0: i32) -> (i32, i32, i32) {
    %c0_i32 = arith.constant 0 : i32
    %c0_i32_0 = arith.constant 0 : i32
    %c0_i32_1 = arith.constant 0 : i32
    return %arg0, %c0_i32, %c0_i32_0 : i32, i32, i32
  }
  func.func @transform_8(%arg0: i32) -> (i32, i32, i32) {
    %c0_i32 = arith.constant 0 : i32
    %c0_i32_0 = arith.constant 0 : i32
    %c0_i32_1 = arith.constant 0 : i32
    return %arg0, %c0_i32, %c0_i32_0 : i32, i32, i32
  }
}

</mosaic_0001>

<bundles_post_ra>
// kernel: modified_lenet_forward.1
= control target key start
LH: loop header
LB: loop body
LE: loop exit
PB: predicated region body
PF: predicated region fallthrough
CT: control target
= control target key end

     0   :  { %14 = vsyncpa [#allocation4], 0  ;;  %s2638_s0 = inlined_call_operand.vmem [shape: f32[4,16,48], index: 0, kind: input, shape index: {}]   ;;  %s2639_s1 = inlined_call_operand.hbm [shape: f32[5,48,48], index: 1, kind: input, shape index: {}]   ;;  %s2640_s2 = inlined_call_operand.vmem [shape: f32[1,48], index: 2, kind: input, shape index: {}]   ;;  %s2641_s3 = inlined_call_operand.hbm [shape: f32[5,48,48], index: 3, kind: input, shape index: {}]   ;;  %s2642_s4 = inlined_call_operand.vmem [shape: f32[1,48], index: 4, kind: input, shape index: {}]   ;;  %s2643_s5 = inlined_call_operand.vmem [shape: f32[16,48,128], index: 5, kind: input, shape index: {}]   ;;  %s2644_s6 = inlined_call_operand.vmem [shape: f32[1,128], index: 6, kind: input, shape index: {}]   ;;  %s2645_s7 = inlined_call_operand.hbm [shape: f32[4,1,128], index: 7, kind: output, shape index: {0}]   ;;  %s2646_s8 = inlined_call_operand.vmem [shape: f32[4,16,48], index: 8, kind: output, shape index: {1}]  }
   0x1   :  { %15 = vsyncpa [#allocation7], 0 }
   0x2   :  { %16 = vsyncpa [#allocation5], 0 }
   0x3   :  { %18 = vsyncpa [#allocation5 + $0x1], 0  ;;  %s2035_s27 = smov 0   ;;  %s2037_s28 = smov 0  }
   0x4   :  { %s2039_s29 = smov 0   ;;  %s2041_s30 = smov 0  }
   0x5 LB: > { %s2056_s9 = sadd.s32 4294967295, %s1982_s30   ;;  %s1618_s10 = sadd.s32 4294967294, %s1982_s30   ;;  %s1982_s30 = sphi %s2041_s30, %s2653_s30   ;;  %s1978_s29 = sphi %s2039_s29, %s2652_s29   ;;  %s1974_s28 = sphi %s2037_s28, %s2651_s28   ;;  %s1970_s27 = sphi %s2035_s27, %s2650_s27  }
   0x6   : > { %s2060_s11 = sadd.s32 1, %s1982_s30   ;;  %s183_s12 = sadd.s32 1, %s1978_s29 }
   0x7   : > { %s180_s13 = ssub.s32 %s1982_s30, %s2060_s11  ;;  %p193_p0 = scmp.ne.s32.totalorder %s1978_s29, %s1974_s28 }
   0x8   : > { %p181_p1 = scmp.eq.s32.totalorder %s180_s13, 0  ;;  %p194_p2 = scmp.eq.s32.totalorder %s2056_s9, 1 }
   0x9   : > { %p199_p3 = scmp.ne.s32.totalorder %s1974_s28, %s1970_s27  ;;  %p200_p4 = scmp.eq.s32.totalorder %s1618_s10, 1 }
   0xa   : > { %s2071_s14 = scalar_select %p181_p1, %s1978_s29, %s183_s12  }
   0xb   : > { %p2073_p5 = por %p194_p2, %p193_p0  ;;  %p2077_p6 = por %p200_p4, %p199_p3 }
   0xc   : > { %p1619_p7 = scmp.ge.s32.totalorder %s1982_s30, 1  ;;  %p233_p8 = scmp.lt.s32.totalorder %s1982_s30, 3 }
   0xd   : > { %p1806_p9 = scmp.eq.s32.totalorder %s2056_s9, 0  ;;  %s244_s20 = sshll.u32 %s2639_s1, 4  ;;  %s245_s20 = int_to_ptr.hbm [resolvable:$true] %s244_s20 }
   0xe   : > { %p2084_p10 = pnand %p1619_p7, %p233_p8  ;;  %s1984_s21 = smov [#allocation3]  }
   0xf   : > { %s246_s22 = sshll.u32 %s1984_s21, 4  ;;  %s261_s25 = sshll.u32 %s2641_s3, 4  ;;  %s247_s22 = int_to_ptr.vmem [resolvable:$true] %s246_s22  ;;  %s262_s25 = int_to_ptr.hbm [resolvable:$true] %s261_s25 }
  0x10   : > { %p1795_p11 = pneg %p2084_p10  ;;  %s1985_s26 = smov 128  }
  0x11   : > { %s1986_s10 = smov 8   ;;  %s1987_s12 = smov [#allocation6]  }
  0x12   : > { %p1796_p12 = pnand %p1806_p9, %p1795_p11  ;;  %s263_s13 = sshll.u32 %s1987_s12, 4  ;;  %s264_s13 = int_to_ptr.vmem [resolvable:$true] %s263_s13 }
  0x13   : > { %298 = sbr.rel (%p2084_p10) target bundleno = 596 (0x254), region = 48 }
  0x14   : > { %1798 = dma.hbm_to_vmem [thread:$0]  (!%p1796_p12), %s245_s20, 3840, %s247_s22, [#allocation4], %s1985_s26, %s1985_s26, %s1986_s10  }
  0x15   : > { %1801 = dma.hbm_to_vmem [thread:$0]  (!%p1796_p12), %s262_s25, 3840, %s264_s13, [#allocation7], %s1985_s26, %s1985_s26, %s1986_s10  }
  0x18   : > { %1957 = dma.done.wait (%p1806_p9), [#allocation4], 3840  }
  0x19   : > { %1959 = vsyncadd (%p1806_p9), [#allocation4], 4294963456 }
  0x1a   : > { %1961 = dma.done.wait (%p1806_p9), [#allocation7], 3840  }
  0x1b   : > { %1963 = vsyncadd (%p1806_p9), [#allocation7], 4294963456  ;;  %s2109_s18 = sshll.u32 %s2056_s9, 1  ;;  %v399_v0 = vld [vmem:[#allocation3 + $0x58] sm:$0xff]  ;;  %v388_v1 = vld [vmem:[#allocation3 + $0x28] sm:$0xff]  ;;  %vm364_vm0 = vcmask 392192  }
  0x1c   : > { %p346_p13 = scmp.lt.s32.totalorder %s2109_s18, 3  ;;  %v398_v2 = vld [vmem:[#allocation3 + $0x50] sm:$0xff]  ;;  %422 = vmatpush.msra.mxu0 %v399_v0  ;;  %578 = vmatpush.msra.mxu3 %v388_v1  ;;  %v387_v3 = vld [vmem:[#allocation3 + $0x20] sm:$0xff]  ;;  %v397_v4 = vld [vmem:[#allocation3 + $0x48] sm:$0xff]  ;;  %vm369_vm1 = vcmask 385024   ;;  %vm372_vm2 = vcmask 392199   ;;  %s1500_s23 = scalar_lea.hbm %s2645_s7, %s2109_s18 }
  0x1d   : > { %v386_v5 = vld [vmem:[#allocation3 + $0x18] sm:$0xff]  ;;  %v396_v6 = vld [vmem:[#allocation3 + $0x40] sm:$0xff]  ;;  %v385_v7 = vld [vmem:[#allocation3 + $0x10] sm:$0xff]  ;;  %vm969_vm3 = vcmask 1041409   ;;  %s1503_s26 = sshll.u32 %s1500_s23, 4  ;;  %s1504_s26 = int_to_ptr.hbm [resolvable:$true] %s1503_s26 }
  0x1e   : > { %s2113_s17 = scalar_select %p346_p13, %s2109_s18, 3  ;;  %423 = vmatpush.msra.mxu0 %v398_v2  ;;  %579 = vmatpush.msra.mxu3 %v387_v3  ;;  %v395_v9 = vld [vmem:[#allocation3 + $0x38] sm:$0xff]  ;;  %v384_v10 = vld [vmem:[#allocation3 + $0x8] sm:$0xff]  ;;  %v513_v15 = vld [vmem:[#allocation3 + $0xe0] sm:$0xff] }
  0x1f   : > { %v514_v13 = vld [vmem:[#allocation3 + $0xe8] sm:$0xff]  ;;  %v462_v14 = vld [vmem:[#allocation3 + $0xb8] sm:$0xff]  ;;  %v461_v16 = vld [vmem:[#allocation3 + $0xb0] sm:$0xff]  ;;  %s1926_s13 = sshra.s32 %s1504_s26, 4  ;;  %s1927_s13 = int_to_ptr.hbm [resolvable:$true] %s1926_s13 }
  0x20   : > { %s1783_s19 = sshll.u32 %s2113_s17, 4  ;;  %424 = vmatpush.msra.mxu0 %v397_v4  ;;  %580 = vmatpush.msra.mxu3 %v386_v5  ;;  %v394_v17 = vld [vmem:[#allocation3 + $0x30] sm:$0xff]  ;;  %v383_v18 = vld [vmem:[#allocation3] sm:$0xff]  ;;  %v451_v19 = vld [vmem:[#allocation3 + $0x88] sm:$0xff]  ;;  %s334_s17 = sand.u32 1, %s1974_s28  }
  0x21   : > { %s2121_s9 = scalar_lea.vmem %s2638_s0, %s1783_s19  ;;  %537 = vmatpush.msra.mxu2 %v514_v13  ;;  %485 = vmatpush.msra.mxu1 %v462_v14  ;;  %v512_v20 = vld [vmem:[#allocation3 + $0xd8] sm:$0xff]  ;;  %v460_v22 = vld [vmem:[#allocation3 + $0xa8] sm:$0xff]  ;;  %v511_v23 = vld [vmem:[#allocation3 + $0xd0] sm:$0xff]  ;;  %s2355_s12 = scalar_lea.vmem %s2646_s8, %s1783_s19 }
  0x22   : > { %v360_v8 = vld [vmem:[%s2121_s9] sm:$0xff]  ;;  %v361_v11 = vld [vmem:[%s2121_s9 + $0x8] sm:$0xff]  ;;  %v362_v12 = vld [vmem:[%s2121_s9 + $0x10] sm:$0xff]  ;;  %425 = vmatpush.msra.mxu0 %v396_v6  ;;  %581 = vmatpush.msra.mxu3 %v385_v7  ;;  %s1626_s21 = sshll.u32 %s334_s17, 1  ;;  %s1484_s10 = scalar_lea.sflag [#allocation5], %s334_s17 }
  0x23   : > { %365 = vst.msk [vmem:[#allocation2 + $0x2] sm:$0xff] %vm364_vm0, %v360_v8  ;;  %v363_v21 = vld [vmem:[%s2121_s9 + $0x18] sm:$0xff]  ;;  %538 = vmatpush.msra.mxu2 %v513_v15  ;;  %486 = vmatpush.msra.mxu1 %v461_v16  ;;  %v450_v24 = vld [vmem:[#allocation3 + $0x80] sm:$0xff]  ;;  %v449_v29 = vld [vmem:[#allocation3 + $0x78] sm:$0xff]  ;;  %s336_s24 = scalar_lea.vmem [#allocation8], %s1626_s21  ;;  %s1928_s20 = scalar_lea.hbm %s1927_s13, 2 }
  0x24   : > { %375 = vst.msk [vmem:[#allocation2 + $0x1] sm:$0x1] %vm369_vm1, %v360_v8  ;;  %426 = vmatpush.msra.mxu0 %v395_v9  ;;  %582 = vmatpush.msra.mxu3 %v384_v10  ;;  %v459_v25 = vld [vmem:[#allocation3 + $0xa0] sm:$0xff]  ;;  %v510_v27 = vld [vmem:[#allocation3 + $0xc8] sm:$0xff]  ;;  %v458_v30 = vld [vmem:[#allocation3 + $0x98] sm:$0xff]  ;;  %s1501_s25 = sshll.u32 %s336_s24, 4  ;;  %p1929_p0 = scmp.ne.s32.totalorder %s1927_s13, %s1928_s20  ;;  %s1502_s25 = int_to_ptr.vmem [resolvable:$true] %s1501_s25 }
  0x25   : > { %370 = vst.msk [vmem:[#allocation2] sm:$0x1] %vm369_vm1, %v360_v8  ;;  %539 = vmatpush.msra.mxu2 %v512_v20  ;;  %487 = vmatpush.msra.mxu1 %v460_v22  ;;  %v509_v31 = vld [vmem:[#allocation3 + $0xc0] sm:$0xff]  ;;  %v448_v32 = vld [vmem:[#allocation3 + $0x70] sm:$0xff]  ;;  %v447_v35 = vld [vmem:[#allocation3 + $0x68] sm:$0xff]  ;;  %s1932_s21 = scalar_lea.hbm %s2645_s7, 4  ;;  %p1933_p3 = scmp.lt.s32.totalorder %s1927_s13, %s2645_s7 }
  0x26   : > { %366 = vst.msk [vmem:[#allocation2 + $0xa] sm:$0xff] %vm364_vm0, %v361_v11  ;;  %427 = vmatpush.msra.mxu0 %v394_v17  ;;  %583 = vmatpush.msra.mxu3 %v383_v18  ;;  %v457_v34 = vld [vmem:[#allocation3 + $0x90] sm:$0xff]  ;;  %v446_v39 = vld [vmem:[#allocation3 + $0x60] sm:$0xff]  ;;  %v690_v54 = vld [vmem:[#allocation6 + $0x58] sm:$0xff]  ;;  %p1930_p1 = pnand %p1929_p0, %p2073_p5  ;;  %p1934_p4 = scmp.lt.s32.totalorder %s1932_s21, %s1928_s20 }
  0x27   : > { %367 = vst.msk [vmem:[#allocation2 + $0x1a] sm:$0xff] %vm364_vm0, %v362_v12  ;;  %540 = vmatpush.msra.mxu2 %v511_v23  ;;  %488 = vmatpush.msra.mxu1 %v459_v25  ;;  %v689_v55 = vld [vmem:[#allocation6 + $0x50] sm:$0xff]  ;;  %v688_v57 = vld [vmem:[#allocation6 + $0x48] sm:$0xff]  ;;  %v678_v60 = vld [vmem:[#allocation6 + $0x20] sm:$0xff] }
  0x28   : > { %376 = vst.msk [vmem:[#allocation2 + $0x19] sm:$0x1] %vm369_vm1, %v362_v12  ;;  %619 = vmatpush.msrb.mxu0 %v451_v19  ;;  %v679_v59 = vld [vmem:[#allocation6 + $0x28] sm:$0xff]  ;;  %v687_v61 = vld [vmem:[#allocation6 + $0x40] sm:$0xff]  ;;  %v686_v62 = vld [vmem:[#allocation6 + $0x38] sm:$0xff]  ;;  %p1931_p2 = pneg %p1930_p1  ;;  %p1935_p7 = por %p1934_p4, %p1933_p3 }
  0x29   : > { %371 = vst.msk [vmem:[#allocation2 + $0x18] sm:$0x1] %vm369_vm1, %v362_v12  ;;  %541 = vmatpush.msra.mxu2 %v510_v27  ;;  %489 = vmatpush.msra.mxu1 %v458_v30  ;;  %v677_v63 = vld [vmem:[#allocation6 + $0x18] sm:$0xff]  ;;  %v676_v0 = vld [vmem:[#allocation6 + $0x10] sm:$0xff]  ;;  %v805_v3 = vld [vmem:[#allocation6 + $0xe8] sm:$0xff] }
  0x2a   : > { %368 = vst.msk [vmem:[#allocation2 + $0x22] sm:$0xff] %vm364_vm0, %v363_v21  ;;  %620 = vmatpush.msrb.mxu0 %v450_v24  ;;  %v441_v50 = vld [vmem:[#allocation2 + $0x2] sm:$0xff]  ;;  %v753_v2 = vld [vmem:[#allocation6 + $0xb8] sm:$0xff]  ;;  %828 = vmatpush.msrb.mxu3 %v805_v3  ;;  %v685_v5 = vld [vmem:[#allocation6 + $0x30] sm:$0xff]  ;;  %p1936_p8 = pnand %p1935_p7, %p1931_p2 }
  0x2b   : > { %v389_v26 = vld [vmem:[#allocation2 + $0x1] sm:$0xff]  ;;  %373 = vst.msk [vmem:[#allocation2 + $0xb] sm:$0x80] %vm372_vm2, %v361_v11  ;;  %542 = vmatpush.msra.mxu2 %v509_v31  ;;  %490 = vmatpush.msra.mxu1 %v457_v34  ;;  %v752_v6 = vld [vmem:[#allocation6 + $0xb0] sm:$0xff]  ;;  %v803_v10 = vld [vmem:[#allocation6 + $0xd8] sm:$0xff] }
  0x2c   : > { %1633 = vmatmul.msk.f32.vlgmr.msra.gmra.mxu0 %vm364_vm0, %v389_v26  ;;  %v379_v28 = vld [vmem:[#allocation2] sm:$0xff]  ;;  %377 = vst.msk [vmem:[#allocation2 + $0xc] sm:$0x80] %vm372_vm2, %v361_v11  ;;  %v675_v4 = vld [vmem:[#allocation6 + $0x8] sm:$0xff]  ;;  %v802_v13 = vld [vmem:[#allocation6 + $0xd0] sm:$0xff] }
  0x2d   : > { %1645 = vmatmul.msk.f32.vlgmr.msra.gmra.mxu3 %vm364_vm0, %v379_v28  ;;  %374 = vst.msk [vmem:[#allocation2 + $0x23] sm:$0x80] %vm372_vm2, %v363_v21  ;;  %v504_v33 = vld [vmem:[#allocation2 + $0x4] sm:$0xff]  ;;  %621 = vmatpush.msrb.mxu0 %v449_v29  ;;  %v749_v16 = vld [vmem:[#allocation6 + $0x98] sm:$0xff]  ;;  %v748_v18 = vld [vmem:[#allocation6 + $0x90] sm:$0xff] }
  0x2e   : > { %378 = vst.msk [vmem:[#allocation2 + $0x24] sm:$0x80] %vm372_vm2, %v363_v21  ;;  %v452_v36 = vld [vmem:[#allocation2 + $0x3] sm:$0xff]  ;;  %1641 = vmatmul.msk.f32.vlgmr.msra.gmra.mxu2 %vm364_vm0, %v504_v33  ;;  %v443_v52 = vld [vmem:[#allocation2 + $0x1a] sm:$0xff]  ;;  %713 = vmatpush.msrb.mxu1 %v690_v54  ;;  %v739_v33 = vld [vmem:[#allocation6 + $0x70] sm:$0xff] }
  0x2f   : > { %v390_v37 = vld [vmem:[#allocation2 + $0x9] sm:$0xff]  ;;  %622 = vmatpush.msrb.mxu0 %v448_v32  ;;  %1637 = vmatmul.msk.f32.vlgmr.msra.gmra.mxu1 %vm364_vm0, %v452_v36  ;;  %v391_v42 = vld [vmem:[#allocation2 + $0x19] sm:$0xff] }
  0x30   : > { %v380_v38 = vld [vmem:[#allocation2 + $0x8] sm:$0xff]  ;;  %v381_v43 = vld [vmem:[#allocation2 + $0x18] sm:$0xff]  ;;  %714 = vmatpush.msrb.mxu1 %v689_v55  ;;  %776 = vmatpush.msrb.mxu2 %v753_v2  ;;  %v804_v7 = vld [vmem:[#allocation6 + $0xe0] sm:$0xff] }
  0x31   : > { %623 = vmatpush.msrb.mxu0 %v447_v35  ;;  %v506_v44 = vld [vmem:[#allocation2 + $0x1c] sm:$0xff]  ;;  %v442_v51 = vld [vmem:[#allocation2 + $0xa] sm:$0xff]  ;;  %829 = vmatpush.msrb.mxu3 %v804_v7 }
  0x32   : > { %v453_v41 = vld [vmem:[#allocation2 + $0xb] sm:$0xff]  ;;  %v454_v45 = vld [vmem:[#allocation2 + $0x1b] sm:$0xff]  ;;  %715 = vmatpush.msrb.mxu1 %v688_v57  ;;  %777 = vmatpush.msrb.mxu2 %v752_v6 }
  0x33   : > { %624 = vmatpush.msrb.mxu0 %v446_v39  ;;  %v505_v40 = vld [vmem:[#allocation2 + $0xc] sm:$0xff]  ;;  %v392_v46 = vld [vmem:[#allocation2 + $0x21] sm:$0xff]  ;;  %830 = vmatpush.msrb.mxu3 %v803_v10  ;;  %v1849_v29 = vld [vmem:[%s2640_s2] ss:$0 sm:$0xff] }
  0x34   : > { %1634 = vmatmul.msk.f32.gmra.mxu0 %vm364_vm0, %v390_v37  ;;  %v382_v47 = vld [vmem:[#allocation2 + $0x20] sm:$0xff]  ;;  %716 = vmatpush.msrb.mxu1 %v687_v61  ;;  %v751_v9 = vld [vmem:[#allocation6 + $0xa8] sm:$0xff]  ;;  %v740_v31 = vld [vmem:[#allocation6 + $0x78] sm:$0xff] }
  0x35   : > { %1646 = vmatmul.msk.f32.gmra.mxu3 %vm364_vm0, %v380_v38  ;;  %v507_v48 = vld [vmem:[#allocation2 + $0x24] sm:$0xff]  ;;  %869 = vmatpush.msra.mxu0 %v679_v59 }
  0x36   : > { %1642 = vmatmul.msk.f32.gmra.mxu2 %vm364_vm0, %v505_v40  ;;  %v455_v49 = vld [vmem:[#allocation2 + $0x23] sm:$0xff]  ;;  %717 = vmatpush.msrb.mxu1 %v686_v62 }
  0x37   : > { %1638 = vmatmul.msk.f32.gmra.mxu1 %vm364_vm0, %v453_v41  ;;  %v444_v53 = vld [vmem:[#allocation2 + $0x22] sm:$0xff]  ;;  %870 = vmatpush.msra.mxu0 %v678_v60 }
  0x38   : > { %718 = vmatpush.msrb.mxu1 %v685_v5  ;;  %v674_v8 = vld [vmem:[#allocation6] sm:$0xff]  ;;  %778 = vmatpush.msrb.mxu2 %v751_v9  ;;  %v801_v17 = vld [vmem:[#allocation6 + $0xc8] sm:$0xff] }
  0x39   : > { %871 = vmatpush.msra.mxu0 %v677_v63  ;;  %v750_v12 = vld [vmem:[#allocation6 + $0xa0] sm:$0xff]  ;;  %831 = vmatpush.msrb.mxu3 %v802_v13  ;;  %v742_v21 = vld [vmem:[#allocation6 + $0x88] sm:$0xff] }
  0x3a   : > { %779 = vmatpush.msrb.mxu2 %v750_v12  ;;  %v800_v19 = vld [vmem:[#allocation6 + $0xc0] sm:$0xff]  ;;  %910 = vmatpush.msra.mxu1 %v742_v21  ;;  %v738_v35 = vld [vmem:[#allocation6 + $0x68] sm:$0xff]  ;;  %v1678_v21 = vld [vmem:[%s2643_s5 + $0x58] sm:$0xff] }
  0x3b   : > { %872 = vmatpush.msra.mxu0 %v676_v0  ;;  %832 = vmatpush.msrb.mxu3 %v801_v17  ;;  %v741_v22 = vld [vmem:[#allocation6 + $0x80] sm:$0xff] }
  0x3c   : > { %1635 = vmatmul.msk.f32.gmra.mxu0 %vm364_vm0, %v391_v42  ;;  %780 = vmatpush.msrb.mxu2 %v749_v16 }
  0x3d   : > { %1647 = vmatmul.msk.f32.gmra.mxu3 %vm364_vm0, %v381_v43  ;;  %873 = vmatpush.msra.mxu0 %v675_v4 }
  0x3e   : > { %1643 = vmatmul.msk.f32.gmra.mxu2 %vm364_vm0, %v506_v44  ;;  %833 = vmatpush.msrb.mxu3 %v800_v19  ;;  %v737_v44 = vld [vmem:[#allocation6 + $0x60] sm:$0xff] }
  0x3f   : > { %1639 = vmatmul.msk.f32.gmra.mxu1 %vm364_vm0, %v454_v45  ;;  %874 = vmatpush.msra.mxu0 %v674_v8 }
  0x40   : > { %781 = vmatpush.msrb.mxu2 %v748_v18  ;;  %911 = vmatpush.msra.mxu1 %v741_v22  ;;  %v1691_v22 = vld [vmem:[%s2643_s5 + $0xb8] sm:$0xff] }
  0x41   : > { %1022 = vmatpush.msra.mxu3 %v1691_v22  ;;  %v1694_v22 = vld [vmem:[%s2643_s5 + $0xc8] sm:$0xff] }
  0x42   : > { %912 = vmatpush.msra.mxu1 %v740_v31  ;;  %983 = vmatpush.msra.mxu2 %v1678_v21  ;;  %v1688_v31 = vld [vmem:[%s2643_s5 + $0xa0] sm:$0xff] }
  0x44   : > { %1636 = vmatmul.msk.f32.gmra.mxu0 %vm364_vm0, %v392_v46  ;;  %913 = vmatpush.msra.mxu1 %v739_v33  ;;  %v1673_v33 = vld [vmem:[%s2643_s5 + $0x30] sm:$0xff] }
  0x45   : > { %1648 = vmatmul.msk.f32.gmra.mxu3 %vm364_vm0, %v382_v47 }
  0x46   : > { %1644 = vmatmul.msk.f32.gmra.mxu2 %vm364_vm0, %v507_v48  ;;  %914 = vmatpush.msra.mxu1 %v738_v35  ;;  %v1704_v35 = vld [vmem:[%s2643_s5 + $0x118] sm:$0xff] }
  0x47   : > { %1640 = vmatmul.msk.f32.gmra.mxu1 %vm364_vm0, %v455_v49 }
  0x48   : > { %915 = vmatpush.msra.mxu1 %v737_v44 }
  0x4c   : > { %1649 = vmatmul.msk.f32.vlgmr.msrb.gmra.mxu0 %vm364_vm0, %v441_v50 }
  0x54   : > { %1650 = vmatmul.msk.f32.gmra.mxu0 %vm364_vm0, %v442_v51 }
  0x5c   : > { %1651 = vmatmul.msk.f32.gmra.mxu0 %vm364_vm0, %v443_v52 }
  0x64   : > { %1652 = vmatmul.msk.f32.gmra.mxu0 %vm364_vm0, %v444_v53 }
  0xa9   : > { %v429_v56 = vpop.f32.mrf.mxu0 }
  0xac   : > { %v492_v15 = vpop.f32.mrf.mxu1 }
  0xb0   : > { %v585_v11 = vpop.f32.mrf.mxu3 }
  0xb1   : > { %v2159_v58 = vpop.f32.mrf.mxu0  ;;  %v544_v20 = vpop.f32.mrf.mxu2  ;;  %v586_v24 = vadd.f32 %v585_v11, %v429_v56 }
  0xb4   : > { %v495_v27 = vpop.f32.mrf.mxu1 }
  0xb8   : > { %v588_v26 = vpop.f32.mrf.mxu3 }
  0xb9   : > { %v2161_v1 = vpop.f32.mrf.mxu0  ;;  %v547_v32 = vpop.f32.mrf.mxu2  ;;  %v589_v37 = vadd.f32 %v588_v26, %v2159_v58  ;;  %v1690_v26 = vld [vmem:[%s2643_s5 + $0xb0] sm:$0xff] }
  0xba   : > { %1023 = vmatpush.msra.mxu3 %v1690_v26 }
  0xbc   : > { %v498_v42 = vpop.f32.mrf.mxu1 }
  0xc0   : > { %v591_v41 = vpop.f32.mrf.mxu3 }
  0xc1   : > { %v2163_v14 = vpop.f32.mrf.mxu0  ;;  %v550_v47 = vpop.f32.mrf.mxu2  ;;  %v592_v48 = vadd.f32 %v591_v41, %v2161_v1  ;;  %v1756_v41 = vld [vmem:[%s2643_s5 + $0x298] sm:$0xff] }
  0xc2   : > { %1218 = vmatpush.msrb.mxu0 %v1756_v41 }
  0xc4   : > { %v501_v56 = vpop.f32.mrf.mxu1 }
  0xc8   : > { %v594_v55 = vpop.f32.mrf.mxu3 }
  0xc9   : > { %v626_v23 = vpop.f32.mrf.mxu0  ;;  %v595_v59 = vadd.f32 %v594_v55, %v2163_v14  ;;  %v553_v62 = vpop.f32.mrf.mxu2  ;;  %v1713_v55 = vld [vmem:[%s2643_s5 + $0x158] sm:$0xff] }
  0xca   : > { %v627_v25 = vadd.f32 %v626_v23, %v492_v15 }
  0xcc   : > { %v638_v28 = vadd.f32 %v627_v25, %v586_v24  ;;  %v1677_v25 = vld [vmem:[%s2643_s5 + $0x50] sm:$0xff] }
  0xcd   : > { %984 = vmatpush.msra.mxu2 %v1677_v25  ;;  %v1693_v25 = vld [vmem:[%s2643_s5 + $0xc0] sm:$0xff] }
  0xce   : > { %v642_v30 = vadd.f32 %v638_v28, %v544_v20  ;;  %v1689_v28 = vld [vmem:[%s2643_s5 + $0xa8] sm:$0xff] }
  0xcf   : > { %1024 = vmatpush.msra.mxu3 %v1689_v28 }
  0xd0   : > { %v650_v34 = vadd.f32 %v1849_v29, %v642_v30  ;;  %v1674_v30 = vld [vmem:[%s2643_s5 + $0x38] sm:$0xff] }
  0xd1   : > { %v629_v36 = vpop.f32.mrf.mxu0  ;;  %1025 = vmatpush.msra.mxu3 %v1688_v31 }
  0xd2   : > { %v654_v38 = vmax.f32 %v650_v34, 0.0  ;;  %v630_v39 = vadd.f32 %v629_v36, %v495_v27  ;;  %v1676_v27 = vld [vmem:[%s2643_s5 + $0x48] sm:$0xff]  ;;  %v1687_v34 = vld [vmem:[%s2643_s5 + $0x98] sm:$0xff]  ;;  %v1686_v36 = vld [vmem:[%s2643_s5 + $0x90] sm:$0xff] }
  0xd3   : > { %985 = vmatpush.msra.mxu2 %v1676_v27  ;;  %1026 = vmatpush.msra.mxu3 %v1687_v34 }
  0xd4   : > { %662 = vst.msk [vmem:[#allocation2] sm:$0x1] %vm369_vm1, %v654_v38  ;;  %v639_v40 = vadd.f32 %v630_v39, %v589_v37  ;;  %v1703_v37 = vld [vmem:[%s2643_s5 + $0x110] sm:$0xff]  ;;  %v1702_v39 = vld [vmem:[%s2643_s5 + $0x108] sm:$0xff] }
  0xd5   : > { %666 = vst.msk [vmem:[#allocation2 + $0x1] sm:$0x1] %vm369_vm1, %v654_v38  ;;  %1027 = vmatpush.msra.mxu3 %v1686_v36 }
  0xd6   : > { %658 = vst.msk [vmem:[#allocation2 + $0x2] sm:$0xff] %vm364_vm0, %v654_v38  ;;  %v643_v43 = vadd.f32 %v639_v40, %v547_v32  ;;  %v1717_v38 = vld [vmem:[%s2643_s5 + $0x178] sm:$0xff]  ;;  %v1716_v40 = vld [vmem:[%s2643_s5 + $0x170] sm:$0xff] }
  0xd8   : > { %v651_v45 = vadd.f32 %v1849_v29, %v643_v43 }
  0xd9   : > { %v632_v46 = vpop.f32.mrf.mxu0 }
  0xda   : > { %v655_v49 = vmax.f32 %v651_v45, 0.0  ;;  %v633_v50 = vadd.f32 %v632_v46, %v498_v42  ;;  %v1769_v42 = vld [vmem:[%s2643_s5 + $0x2f8] sm:$0xff]  ;;  %v1701_v45 = vld [vmem:[%s2643_s5 + $0x100] sm:$0xff]  ;;  %v1715_v46 = vld [vmem:[%s2643_s5 + $0x168] sm:$0xff] }
  0xdc   : > { %664 = vst.msk [vmem:[#allocation2 + $0xb] sm:$0x80] %vm372_vm2, %v655_v49  ;;  %v640_v51 = vadd.f32 %v633_v50, %v592_v48  ;;  %v1768_v48 = vld [vmem:[%s2643_s5 + $0x2f0] sm:$0xff]  ;;  %v1700_v50 = vld [vmem:[%s2643_s5 + $0xf8] sm:$0xff] }
  0xdd   : > { %668 = vst.msk [vmem:[#allocation2 + $0xc] sm:$0x80] %vm372_vm2, %v655_v49  ;;  %v680_v52 = vld [vmem:[#allocation2 + $0x1] sm:$0xff] }
  0xde   : > { %v670_v53 = vld [vmem:[#allocation2] sm:$0xff]  ;;  %659 = vst.msk [vmem:[#allocation2 + $0xa] sm:$0xff] %vm364_vm0, %v655_v49  ;;  %1653 = vmatmul.msk.f32.vlgmr.msrb.gmra.mxu1 %vm364_vm0, %v680_v52  ;;  %v644_v54 = vadd.f32 %v640_v51, %v550_v47  ;;  %v1755_v47 = vld [vmem:[%s2643_s5 + $0x290] sm:$0xff]  ;;  %v1754_v52 = vld [vmem:[%s2643_s5 + $0x288] sm:$0xff] }
  0xdf   : > { %1665 = vmatmul.msk.f32.vlgmr.msra.gmra.mxu0 %vm364_vm0, %v670_v53  ;;  %v732_v16 = vld [vmem:[#allocation2 + $0x2] sm:$0xff]  ;;  %1257 = vmatpush.msrb.mxu1 %v1769_v42 }
  0xe0   : > { %v652_v57 = vadd.f32 %v1849_v29, %v644_v54  ;;  %1219 = vmatpush.msrb.mxu0 %v1755_v47  ;;  %v1714_v51 = vld [vmem:[%s2643_s5 + $0x160] sm:$0xff]  ;;  %v1767_v53 = vld [vmem:[%s2643_s5 + $0x2e8] sm:$0xff]  ;;  %v1699_v54 = vld [vmem:[%s2643_s5 + $0xf0] sm:$0xff] }
  0xe1   : > { %v635_v58 = vpop.f32.mrf.mxu0  ;;  %1258 = vmatpush.msrb.mxu1 %v1768_v48  ;;  %v1730_v47 = vld [vmem:[%s2643_s5 + $0x1d8] sm:$0xff] }
  0xe2   : > { %v656_v60 = vmax.f32 %v652_v57, 0.0  ;;  %v636_v61 = vadd.f32 %v635_v58, %v501_v56  ;;  %1220 = vmatpush.msrb.mxu0 %v1754_v52  ;;  %v1753_v56 = vld [vmem:[%s2643_s5 + $0x280] sm:$0xff]  ;;  %v1729_v52 = vld [vmem:[%s2643_s5 + $0x1d0] sm:$0xff] }
  0xe3   : > { %1259 = vmatpush.msrb.mxu1 %v1767_v53  ;;  %v1766_v57 = vld [vmem:[%s2643_s5 + $0x2e0] sm:$0xff]  ;;  %v1743_v53 = vld [vmem:[%s2643_s5 + $0x238] sm:$0xff] }
  0xe4   : > { %663 = vst.msk [vmem:[#allocation2 + $0x18] sm:$0x1] %vm369_vm1, %v656_v60  ;;  %v641_v63 = vadd.f32 %v636_v61, %v595_v59  ;;  %1221 = vmatpush.msrb.mxu0 %v1753_v56  ;;  %v1712_v59 = vld [vmem:[%s2643_s5 + $0x150] sm:$0xff]  ;;  %v1765_v61 = vld [vmem:[%s2643_s5 + $0x2d8] sm:$0xff]  ;;  %v1728_v56 = vld [vmem:[%s2643_s5 + $0x1c8] sm:$0xff] }
  0xe5   : > { %667 = vst.msk [vmem:[#allocation2 + $0x19] sm:$0x1] %vm369_vm1, %v656_v60  ;;  %v681_v0 = vld [vmem:[#allocation2 + $0x9] sm:$0xff]  ;;  %1260 = vmatpush.msrb.mxu1 %v1766_v57 }
  0xe6   : > { %v743_v1 = vld [vmem:[#allocation2 + $0x3] sm:$0xff]  ;;  %660 = vst.msk [vmem:[#allocation2 + $0x1a] sm:$0xff] %vm364_vm0, %v656_v60  ;;  %1654 = vmatmul.msk.f32.gmra.mxu1 %vm364_vm0, %v681_v0  ;;  %v645_v4 = vadd.f32 %v641_v63, %v553_v62  ;;  %v744_v8 = vld [vmem:[#allocation2 + $0xb] sm:$0xff]  ;;  %v1752_v60 = vld [vmem:[%s2643_s5 + $0x278] sm:$0xff] }
  0xe7   : > { %v795_v2 = vld [vmem:[#allocation2 + $0x4] sm:$0xff]  ;;  %1657 = vmatmul.msk.f32.vlgmr.msrb.gmra.mxu2 %vm364_vm0, %v743_v1  ;;  %v796_v10 = vld [vmem:[#allocation2 + $0xc] sm:$0xff]  ;;  %1222 = vmatpush.msrb.mxu0 %v1752_v60 }
  0xe8   : > { %v671_v3 = vld [vmem:[#allocation2 + $0x8] sm:$0xff]  ;;  %1661 = vmatmul.msk.f32.vlgmr.msrb.gmra.mxu3 %vm364_vm0, %v795_v2  ;;  %v653_v5 = vadd.f32 %v1849_v29, %v645_v4  ;;  %v1675_v29 = vld [vmem:[%s2643_s5 + $0x40] sm:$0xff]  ;;  %1261 = vmatpush.msrb.mxu1 %v1765_v61  ;;  %v1751_v63 = vld [vmem:[%s2643_s5 + $0x270] sm:$0xff] }
  0xe9   : > { %1666 = vmatmul.msk.f32.gmra.mxu0 %vm364_vm0, %v671_v3  ;;  %v733_v18 = vld [vmem:[#allocation2 + $0xa] sm:$0xff]  ;;  %986 = vmatpush.msra.mxu2 %v1675_v29  ;;  %v1727_v60 = vld [vmem:[%s2643_s5 + $0x1c0] sm:$0xff] }
  0xea   : > { %v657_v6 = vmax.f32 %v653_v5, 0.0  ;;  %1100 = vmatpush.msrb.mxu3 %v1717_v38  ;;  %v1764_v0 = vld [vmem:[%s2643_s5 + $0x2d0] sm:$0xff]  ;;  %v1698_v3 = vld [vmem:[%s2643_s5 + $0xe8] sm:$0xff]  ;;  %1223 = vmatpush.msrb.mxu0 %v1751_v63 }
  0xeb   : > { %987 = vmatpush.msra.mxu2 %v1674_v30  ;;  %1262 = vmatpush.msrb.mxu1 %v1764_v0  ;;  %v1711_v5 = vld [vmem:[%s2643_s5 + $0x148] sm:$0xff]  ;;  %v1742_v57 = vld [vmem:[%s2643_s5 + $0x230] sm:$0xff] }
  0xec   : > { %665 = vst.msk [vmem:[#allocation2 + $0x23] sm:$0x80] %vm372_vm2, %v657_v6  ;;  %1101 = vmatpush.msrb.mxu3 %v1716_v40  ;;  %1331 = vmatpush.msra.mxu0 %v1698_v3  ;;  %v1741_v61 = vld [vmem:[%s2643_s5 + $0x228] sm:$0xff] }
  0xed   : > { %669 = vst.msk [vmem:[#allocation2 + $0x24] sm:$0x80] %vm372_vm2, %v657_v6  ;;  %v682_v7 = vld [vmem:[#allocation2 + $0x19] sm:$0xff]  ;;  %988 = vmatpush.msra.mxu2 %v1673_v33 }
  0xee   : > { %v672_v9 = vld [vmem:[#allocation2 + $0x18] sm:$0xff]  ;;  %661 = vst.msk [vmem:[#allocation2 + $0x22] sm:$0xff] %vm364_vm0, %v657_v6  ;;  %1655 = vmatmul.msk.f32.gmra.mxu1 %vm364_vm0, %v682_v7  ;;  %1102 = vmatpush.msrb.mxu3 %v1715_v46  ;;  %v2329_v7 = vld [vmem:[%s2642_s4] ss:$0 sm:$0xff] }
  0xef   : > { %1658 = vmatmul.msk.f32.gmra.mxu2 %vm364_vm0, %v744_v8  ;;  %v734_v19 = vld [vmem:[#allocation2 + $0x1a] sm:$0xff] }
  0xf0   : > { %1662 = vmatmul.msk.f32.gmra.mxu3 %vm364_vm0, %v796_v10  ;;  %1061 = vmatpush.msrb.mxu2 %v1704_v35  ;;  %v1697_v8 = vld [vmem:[%s2643_s5 + $0xe0] sm:$0xff] }
  0xf1   : > { %1667 = vmatmul.msk.f32.gmra.mxu0 %vm364_vm0, %v672_v9  ;;  %1103 = vmatpush.msrb.mxu3 %v1714_v51  ;;  %v1710_v10 = vld [vmem:[%s2643_s5 + $0x140] sm:$0xff] }
  0xf2   : > { %1062 = vmatpush.msrb.mxu2 %v1703_v37  ;;  %1332 = vmatpush.msra.mxu0 %v1697_v8 }
  0xf3   : > { %1104 = vmatpush.msrb.mxu3 %v1713_v55 }
  0xf4   : > { %1063 = vmatpush.msrb.mxu2 %v1702_v39 }
  0xf5   : > { %v683_v11 = vld [vmem:[#allocation2 + $0x21] sm:$0xff]  ;;  %1105 = vmatpush.msrb.mxu3 %v1712_v59 }
  0xf6   : > { %v745_v12 = vld [vmem:[#allocation2 + $0x1b] sm:$0xff]  ;;  %1656 = vmatmul.msk.f32.gmra.mxu1 %vm364_vm0, %v683_v11  ;;  %v746_v15 = vld [vmem:[#allocation2 + $0x23] sm:$0xff]  ;;  %1064 = vmatpush.msrb.mxu2 %v1701_v45 }
  0xf7   : > { %v797_v13 = vld [vmem:[#allocation2 + $0x1c] sm:$0xff]  ;;  %1659 = vmatmul.msk.f32.gmra.mxu2 %vm364_vm0, %v745_v12  ;;  %v798_v17 = vld [vmem:[#allocation2 + $0x24] sm:$0xff] }
  0xf8   : > { %v673_v14 = vld [vmem:[#allocation2 + $0x20] sm:$0xff]  ;;  %1663 = vmatmul.msk.f32.gmra.mxu3 %vm364_vm0, %v797_v13  ;;  %1065 = vmatpush.msrb.mxu2 %v1700_v50  ;;  %v1696_v12 = vld [vmem:[%s2643_s5 + $0xd8] sm:$0xff] }
  0xf9   : > { %1668 = vmatmul.msk.f32.gmra.mxu0 %vm364_vm0, %v673_v14  ;;  %v735_v20 = vld [vmem:[#allocation2 + $0x22] sm:$0xff]  ;;  %v1709_v13 = vld [vmem:[%s2643_s5 + $0x138] sm:$0xff] }
  0xfa   : > { %1066 = vmatpush.msrb.mxu2 %v1699_v54  ;;  %1333 = vmatpush.msra.mxu0 %v1696_v12 }
  0xfe   : > { %1669 = vmatmul.msk.f32.vlgmr.msra.gmra.mxu1 %vm364_vm0, %v732_v16  ;;  %v1708_v16 = vld [vmem:[%s2643_s5 + $0x130] sm:$0xff] }
  0xff   : > { %1660 = vmatmul.msk.f32.gmra.mxu2 %vm364_vm0, %v746_v15  ;;  %1356 = vmatpush.msra.mxu1 %v1711_v5  ;;  %v1695_v15 = vld [vmem:[%s2643_s5 + $0xd0] sm:$0xff] }
 0x100   : > { %1664 = vmatmul.msk.f32.gmra.mxu3 %vm364_vm0, %v798_v17  ;;  %1334 = vmatpush.msra.mxu0 %v1695_v15  ;;  %v1738_v15 = vld [vmem:[%s2643_s5 + $0x210] sm:$0xff] }
 0x101   : > { %1357 = vmatpush.msra.mxu1 %v1710_v10  ;;  %v1739_v10 = vld [vmem:[%s2643_s5 + $0x218] sm:$0xff] }
 0x102   : > { %1335 = vmatpush.msra.mxu0 %v1694_v22  ;;  %v956_v22 = vld [vmem:[%s2643_s5 + $0x18] sm:$0xff] }
 0x103   : > { %1358 = vmatpush.msra.mxu1 %v1709_v13 }
 0x104   : > { %1336 = vmatpush.msra.mxu0 %v1693_v25 }
 0x105   : > { %1359 = vmatpush.msra.mxu1 %v1708_v16  ;;  %v1750_v16 = vld [vmem:[%s2643_s5 + $0x268] sm:$0xff] }
 0x106   : > { %1670 = vmatmul.msk.f32.gmra.mxu1 %vm364_vm0, %v733_v18 }
 0x10e   : > { %1671 = vmatmul.msk.f32.gmra.mxu1 %vm364_vm0, %v734_v19 }
 0x116   : > { %1672 = vmatmul.msk.f32.gmra.mxu1 %vm364_vm0, %v735_v20 }
 0x15b   : > { %v2209_v23 = vpop.f32.mrf.mxu1 }
 0x15c   : > { %v876_v43 = vpop.f32.mrf.mxu0 }
 0x15d   : > { %v877_v1 = vadd.f32 %v876_v43, %v2209_v23  ;;  %v1707_v23 = vld [vmem:[%s2643_s5 + $0x128] sm:$0xff] }
 0x15e   : > { %1360 = vmatpush.msra.mxu1 %v1707_v23  ;;  %v1684_v23 = vld [vmem:[%s2643_s5 + $0x80] sm:$0xff] }
 0x163   : > { %v2211_v24 = vpop.f32.mrf.mxu1 }
 0x166   : > { %v879_v4 = vpop.f32.mrf.mxu0 }
 0x167   : > { %v880_v19 = vadd.f32 %v879_v4, %v2211_v24  ;;  %v1706_v24 = vld [vmem:[%s2643_s5 + $0x120] sm:$0xff] }
 0x168   : > { %1361 = vmatpush.msra.mxu1 %v1706_v24  ;;  %v1762_v24 = vld [vmem:[%s2643_s5 + $0x2c0] sm:$0xff] }
 0x16a   : > { %v783_v49 = vpop.f32.mrf.mxu2 }
 0x16b   : > { %v2234_v32 = vpop.f32.mrf.mxu1  ;;  %v835_v58 = vpop.f32.mrf.mxu3 }
 0x16e   : > { %v882_v27 = vpop.f32.mrf.mxu0 }
 0x16f   : > { %v883_v33 = vadd.f32 %v882_v27, %v2234_v32 }
 0x172   : > { %v786_v9 = vpop.f32.mrf.mxu2 }
 0x173   : > { %v2266_v44 = vpop.f32.mrf.mxu1  ;;  %v838_v17 = vpop.f32.mrf.mxu3 }
 0x176   : > { %v885_v39 = vpop.f32.mrf.mxu0 }
 0x177   : > { %v886_v43 = vadd.f32 %v885_v39, %v2266_v44 }
 0x17a   : > { %v789_v29 = vpop.f32.mrf.mxu2 }
 0x17b   : > { %v917_v62 = vpop.f32.mrf.mxu1  ;;  %v841_v36 = vpop.f32.mrf.mxu3 }
 0x17c   : > { %v918_v2 = vadd.f32 %v917_v62, %v783_v49 }
 0x17e   : > { %v929_v6 = vadd.f32 %v918_v2, %v877_v1  ;;  %v1726_v1 = vld [vmem:[%s2643_s5 + $0x1b8] sm:$0xff]  ;;  %v1740_v2 = vld [vmem:[%s2643_s5 + $0x220] sm:$0xff] }
 0x180   : > { %v933_v11 = vadd.f32 %v929_v6, %v835_v58 }
 0x182   : > { %v941_v14 = vadd.f32 %v2329_v7, %v933_v11  ;;  %v792_v41 = vpop.f32.mrf.mxu2 }
 0x183   : > { %v920_v18 = vpop.f32.mrf.mxu1  ;;  %v844_v51 = vpop.f32.mrf.mxu3 }
 0x184   : > { %v2358_v20 = vmax.f32 %v941_v14, 0.0  ;;  %v921_v21 = vadd.f32 %v920_v18, %v786_v9  ;;  %v1725_v9 = vld [vmem:[%s2643_s5 + $0x1b0] sm:$0xff]  ;;  %v958_v14 = vld [vmem:[%s2643_s5 + $0x28] sm:$0xff] }
 0x185   : > { %v1685_v18 = vld [vmem:[%s2643_s5 + $0x88] sm:$0xff] }
 0x186   : > { %949 = vst.msk [vmem:[%s2355_s12] sm:$0xff] %vm364_vm0, %v2358_v20  ;;  %v930_v26 = vadd.f32 %v921_v21, %v880_v19  ;;  %v968_v46 = vrot.slane %v2358_v20, 1  ;;  %v1007_v50 = vrot.slane %v2358_v20, 3  ;;  %v1046_v63 = vrot.slane %v2358_v20, 5  ;;  %v1763_v19 = vld [vmem:[%s2643_s5 + $0x2c8] sm:$0xff]  ;;  %v1749_v21 = vld [vmem:[%s2643_s5 + $0x260] sm:$0xff] }
 0x187   : > { %v1085_v3 = vrot.slane %v2358_v20, 7 }
 0x188   : > { %v934_v28 = vadd.f32 %v930_v26, %v838_v17  ;;  %v957_v17 = vld [vmem:[%s2643_s5 + $0x20] sm:$0xff] }
 0x18a   : > { %v942_v30 = vadd.f32 %v2329_v7, %v934_v28  ;;  %v955_v28 = vld [vmem:[%s2643_s5 + $0x10] sm:$0xff] }
 0x18b   : > { %v923_v31 = vpop.f32.mrf.mxu1 }
 0x18c   : > { %v2377_v34 = vmax.f32 %v942_v30, 0.0  ;;  %v924_v35 = vadd.f32 %v923_v31, %v789_v29  ;;  %v1683_v29 = vld [vmem:[%s2643_s5 + $0x78] sm:$0xff] }
 0x18e   : > { %950 = vst.msk [vmem:[%s2355_s12 + $0x8] sm:$0xff] %vm364_vm0, %v2377_v34  ;;  %v931_v37 = vadd.f32 %v924_v35, %v883_v33  ;;  %v1203_v4 = vrot.slane %v2377_v34, 5  ;;  %v1126_v25 = vrot.slane %v2377_v34, 1  ;;  %v1164_v33 = vrot.slane %v2377_v34, 3 }
 0x18f   : > { %v1316_v35 = vrot.slane %v2358_v20, 4 }
 0x190   : > { %v935_v38 = vadd.f32 %v931_v37, %v841_v36  ;;  %v1341_v36 = vrot.slane %v2358_v20, 6  ;;  %v954_v37 = vld [vmem:[%s2643_s5 + $0x8] sm:$0xff] }
 0x192   : > { %v943_v40 = vadd.f32 %v2329_v7, %v935_v38 }
 0x193   : > { %v926_v42 = vpop.f32.mrf.mxu1 }
 0x194   : > { %v2384_v45 = vmax.f32 %v943_v40, 0.0  ;;  %v927_v32 = vadd.f32 %v926_v42, %v792_v41  ;;  %v1682_v40 = vld [vmem:[%s2643_s5 + $0x70] sm:$0xff]  ;;  %v1748_v41 = vld [vmem:[%s2643_s5 + $0x258] sm:$0xff] }
 0x196   : > { %951 = vst.msk [vmem:[%s2355_s12 + $0x10] sm:$0xff] %vm364_vm0, %v2384_v45  ;;  %v932_v48 = vadd.f32 %v927_v32, %v886_v43  ;;  %v970_v49 = vsel %vm969_vm3, %v2384_v45, %v968_v46  ;;  %v1008_v44 = vrot.slane %v2384_v45, 2  ;;  %v1047_v59 = vrot.slane %v2384_v45, 4  ;;  %v1761_v43 = vld [vmem:[%s2643_s5 + $0x2b8] sm:$0xff]  ;;  %v953_v32 = vld [vmem:[%s2643_s5] sm:$0xff]  ;;  %v1681_v46 = vld [vmem:[%s2643_s5 + $0x68] sm:$0xff] }
 0x197   : > { %1679 = vmatmul.msk.f32.vlgmr.msra.gmra.mxu2 %vm364_vm0, %v970_v49  ;;  %v1086_v0 = vrot.slane %v2384_v45, 6  ;;  %v1317_v27 = vrot.slane %v2384_v45, 3  ;;  %v1342_v30 = vrot.slane %v2384_v45, 5  ;;  %v1724_v49 = vld [vmem:[%s2643_s5 + $0x1a8] sm:$0xff] }
 0x198   : > { %v936_v54 = vadd.f32 %v932_v48, %v844_v51  ;;  %1140 = vmatpush.msra.mxu2 %v1730_v47  ;;  %v1009_v55 = vsel %vm969_vm3, %v1008_v44, %v1007_v50  ;;  %v1048_v5 = vsel %vm969_vm3, %v1047_v59, %v1046_v63  ;;  %v1747_v47 = vld [vmem:[%s2643_s5 + $0x250] sm:$0xff]  ;;  %v1267_v50 = vrot.slane %v2384_v45, 7  ;;  %v1680_v44 = vld [vmem:[%s2643_s5 + $0x60] sm:$0xff]  ;;  %v1746_v51 = vld [vmem:[%s2643_s5 + $0x248] sm:$0xff] }
 0x199   : > { %1692 = vmatmul.msk.f32.vlgmr.msra.gmra.mxu3 %vm364_vm0, %v1009_v55  ;;  %v1087_v11 = vsel %vm969_vm3, %v1086_v0, %v1085_v3  ;;  %v1318_v39 = vsel %vm969_vm3, %v1317_v27, %v1316_v35  ;;  %v1343_v42 = vsel %vm969_vm3, %v1342_v30, %v1341_v36  ;;  %v1760_v48 = vld [vmem:[%s2643_s5 + $0x2b0] sm:$0xff]  ;;  %v1292_v55 = vrot.slane %v2384_v45, 1  ;;  %v1736_v63 = vld [vmem:[%s2643_s5 + $0x200] sm:$0xff] }
 0x19a   : > { %v944_v58 = vadd.f32 %v2329_v7, %v936_v54  ;;  %1141 = vmatpush.msra.mxu2 %v1729_v52  ;;  %1179 = vmatpush.msra.mxu3 %v1743_v53  ;;  %v1242_v7 = vrot.slane %v2377_v34, 7  ;;  %v1759_v52 = vld [vmem:[%s2643_s5 + $0x2a8] sm:$0xff]  ;;  %v1723_v53 = vld [vmem:[%s2643_s5 + $0x1a0] sm:$0xff]  ;;  %v1291_v45 = vrot.slane %v2358_v20, 2  ;;  %v1415_v0 = vrot.slane %v2377_v34, 4 }
 0x19b   : > { %v1737_v54 = vld [vmem:[%s2643_s5 + $0x208] sm:$0xff] }
 0x19c   : > { %v2420_v62 = vmax.f32 %v944_v58, 0.0  ;;  %1142 = vmatpush.msra.mxu2 %v1728_v56  ;;  %1180 = vmatpush.msra.mxu3 %v1742_v57  ;;  %v1268_v56 = vsel %vm969_vm3, %v1267_v50, %v2358_v20  ;;  %v1745_v57 = vld [vmem:[%s2643_s5 + $0x240] sm:$0xff]  ;;  %v1440_v20 = vrot.slane %v2377_v34, 6 }
 0x19d   : > { %v1758_v58 = vld [vmem:[%s2643_s5 + $0x2a0] sm:$0xff] }
 0x19e   : > { %952 = vst.msk [vmem:[%s2355_s12 + $0x18] sm:$0xff] %vm364_vm0, %v2420_v62  ;;  %1143 = vmatpush.msra.mxu2 %v1727_v60  ;;  %1181 = vmatpush.msra.mxu3 %v1741_v61  ;;  %v1204_v6 = vrot.slane %v2420_v62, 4  ;;  %v1243_v8 = vrot.slane %v2420_v62, 6  ;;  %v1165_v26 = vrot.slane %v2420_v62, 2  ;;  %v1127_v31 = vsel %vm969_vm3, %v2420_v62, %v1126_v25  ;;  %v1722_v60 = vld [vmem:[%s2643_s5 + $0x198] sm:$0xff] }
 0x19f   : > { %1705 = vmatmul.msk.f32.vlgmr.msrb.gmra.mxu2 %vm364_vm0, %v1048_v5  ;;  %v1416_v59 = vrot.slane %v2420_v62, 3  ;;  %v1441_v61 = vrot.slane %v2420_v62, 5 }
 0x1a0   : > { %1144 = vmatpush.msra.mxu2 %v1726_v1  ;;  %1182 = vmatpush.msra.mxu3 %v1740_v2  ;;  %v1205_v12 = vsel %vm969_vm3, %v1204_v6, %v1203_v4  ;;  %v1244_v13 = vsel %vm969_vm3, %v1243_v8, %v1242_v7  ;;  %v1166_v38 = vsel %vm969_vm3, %v1165_v26, %v1164_v33  ;;  %v1721_v2 = vld [vmem:[%s2643_s5 + $0x190] sm:$0xff]  ;;  %v1735_v4 = vld [vmem:[%s2643_s5 + $0x1f8] sm:$0xff]  ;;  %v1720_v6 = vld [vmem:[%s2643_s5 + $0x188] sm:$0xff]  ;;  %v1366_v8 = vrot.slane %v2420_v62, 7 }
 0x1a1   : > { %1718 = vmatmul.msk.f32.vlgmr.msrb.gmra.mxu3 %vm364_vm0, %v1087_v11  ;;  %1757 = vmatmul.msk.f32.vlgmr.msrb.gmra.mxu0 %vm364_vm0, %v1205_v12  ;;  %v1293_v1 = vsel %vm969_vm3, %v1292_v55, %v1291_v45  ;;  %v1417_v3 = vsel %vm969_vm3, %v1416_v59, %v1415_v0  ;;  %v1442_v5 = vsel %vm969_vm3, %v1441_v61, %v1440_v20  ;;  %v1734_v7 = vld [vmem:[%s2643_s5 + $0x1f0] sm:$0xff]  ;;  %v1391_v11 = vrot.slane %v2420_v62, 1 }
 0x1a2   : > { %1145 = vmatpush.msra.mxu2 %v1725_v9  ;;  %1183 = vmatpush.msra.mxu3 %v1739_v10  ;;  %v1719_v9 = vld [vmem:[%s2643_s5 + $0x180] sm:$0xff]  ;;  %v1733_v10 = vld [vmem:[%s2643_s5 + $0x1e8] sm:$0xff]  ;;  %v1367_v12 = vsel %vm969_vm3, %v1366_v8, %v2377_v34 }
 0x1a3   : > { %1770 = vmatmul.msk.f32.vlgmr.msrb.gmra.mxu1 %vm364_vm0, %v1244_v13  ;;  %1430 = vmatpush.msrb.mxu0 %v1750_v16  ;;  %v1732_v13 = vld [vmem:[%s2643_s5 + $0x1e0] sm:$0xff] }
 0x1a4   : > { %1281 = vmatpush.msrb.mxu2 %v958_v14  ;;  %1184 = vmatpush.msra.mxu3 %v1738_v15  ;;  %v1390_v14 = vrot.slane %v2377_v34, 2 }
 0x1a5   : > { %1455 = vmatpush.msrb.mxu1 %v1763_v19  ;;  %1431 = vmatpush.msrb.mxu0 %v1749_v21 }
 0x1a6   : > { %1282 = vmatpush.msrb.mxu2 %v957_v17  ;;  %1306 = vmatpush.msrb.mxu3 %v1685_v18  ;;  %v1392_v15 = vsel %vm969_vm3, %v1391_v11, %v1390_v14 }
 0x1a7   : > { %1731 = vmatmul.msk.f32.vlgmr.msra.gmra.mxu2 %vm364_vm0, %v1127_v31  ;;  %1456 = vmatpush.msrb.mxu1 %v1762_v24 }
 0x1a8   : > { %1283 = vmatpush.msrb.mxu2 %v956_v22  ;;  %1307 = vmatpush.msrb.mxu3 %v1684_v23 }
 0x1a9   : > { %1744 = vmatmul.msk.f32.vlgmr.msra.gmra.mxu3 %vm364_vm0, %v1166_v38  ;;  %1773 = vmatmul.msk.f32.vlgmr.msra.gmra.mxu0 %vm364_vm0, %v1318_v39 }
 0x1aa   : > { %1284 = vmatpush.msrb.mxu2 %v955_v28  ;;  %1308 = vmatpush.msrb.mxu3 %v1683_v29 }
 0x1ab   : > { %1774 = vmatmul.msk.f32.vlgmr.msra.gmra.mxu1 %vm364_vm0, %v1343_v42  ;;  %1432 = vmatpush.msrb.mxu0 %v1748_v41 }
 0x1ac   : > { %1285 = vmatpush.msrb.mxu2 %v954_v37  ;;  %1309 = vmatpush.msrb.mxu3 %v1682_v40 }
 0x1ad   : > { %1457 = vmatpush.msrb.mxu1 %v1761_v43  ;;  %1433 = vmatpush.msrb.mxu0 %v1747_v47 }
 0x1ae   : > { %1286 = vmatpush.msrb.mxu2 %v953_v32  ;;  %1310 = vmatpush.msrb.mxu3 %v1681_v46 }
 0x1af   : > { %1458 = vmatpush.msrb.mxu1 %v1760_v48  ;;  %1434 = vmatpush.msrb.mxu0 %v1746_v51  ;;  %v1851_v48 = vld [vmem:[%s2644_s6] ss:$0 sm:$0xff] }
 0x1b0   : > { %1380 = vmatpush.msra.mxu2 %v1724_v49  ;;  %1311 = vmatpush.msrb.mxu3 %v1680_v44 }
 0x1b1   : > { %1459 = vmatpush.msrb.mxu1 %v1759_v52  ;;  %1771 = vmatmul.msk.f32.vlgmr.msrb.gmra.mxu2 %vm364_vm0, %v1268_v56 }
 0x1b2   : > { %1381 = vmatpush.msra.mxu2 %v1723_v53  ;;  %1405 = vmatpush.msra.mxu3 %v1737_v54 }
 0x1b3   : > { %1435 = vmatpush.msrb.mxu0 %v1745_v57  ;;  %1460 = vmatpush.msrb.mxu1 %v1758_v58 }
 0x1b4   : > { %1772 = vmatmul.msk.f32.vlgmr.msrb.gmra.mxu3 %vm364_vm0, %v1293_v1  ;;  %1382 = vmatpush.msra.mxu2 %v1722_v60 }
 0x1b5   : > { %1406 = vmatpush.msra.mxu3 %v1736_v63  ;;  %1777 = vmatmul.msk.f32.vlgmr.msrb.gmra.mxu0 %vm364_vm0, %v1417_v3 }
 0x1b6   : > { %1778 = vmatmul.msk.f32.vlgmr.msrb.gmra.mxu1 %vm364_vm0, %v1442_v5  ;;  %1383 = vmatpush.msra.mxu2 %v1721_v2 }
 0x1b7   : > { %1407 = vmatpush.msra.mxu3 %v1735_v4 }
 0x1b8   : > { %1384 = vmatpush.msra.mxu2 %v1720_v6 }
 0x1b9   : > { %1408 = vmatpush.msra.mxu3 %v1734_v7 }
 0x1ba   : > { %1385 = vmatpush.msra.mxu2 %v1719_v9 }
 0x1bb   : > { %1409 = vmatpush.msra.mxu3 %v1733_v10  ;;  %1775 = vmatmul.msk.f32.vlgmr.msra.gmra.mxu2 %vm364_vm0, %v1367_v12 }
 0x1bd   : > { %1410 = vmatpush.msra.mxu3 %v1732_v13 }
 0x1be   : > { %1776 = vmatmul.msk.f32.vlgmr.msra.gmra.mxu3 %vm364_vm0, %v1392_v15 }
 0x21a   : > { %v990_v16 = vpop.f32.mrf.mxu2 }
 0x21c   : > { %v1029_v62 = vpop.f32.mrf.mxu3 }
 0x21e   : > { %v1225_v19 = vpop.f32.mrf.mxu0 }
 0x220   : > { %v1264_v21 = vpop.f32.mrf.mxu1 }
 0x222   : > { %v1068_v17 = vpop.f32.mrf.mxu2 }
 0x224   : > { %v1107_v18 = vpop.f32.mrf.mxu3 }
 0x226   : > { %v1338_v25 = vpop.f32.mrf.mxu0 }
 0x227   : > { %v1339_v30 = vadd.f32 %v1338_v25, %v1068_v17 }
 0x228   : > { %v1363_v24 = vpop.f32.mrf.mxu1 }
 0x229   : > { %v1364_v33 = vadd.f32 %v1363_v24, %v1107_v18 }
 0x22a   : > { %v1147_v22 = vpop.f32.mrf.mxu2 }
 0x22b   : > { %v1466_v42 = vadd.f32 %v1364_v33, %v1339_v30 }
 0x22c   : > { %v1186_v23 = vpop.f32.mrf.mxu3 }
 0x232   : > { %v1437_v28 = vpop.f32.mrf.mxu0 }
 0x233   : > { %v1462_v34 = vpop.f32.mrf.mxu1  ;;  %v1438_v35 = vadd.f32 %v1437_v28, %v1225_v19 }
 0x234   : > { %v1288_v26 = vpop.f32.mrf.mxu2  ;;  %v1463_v36 = vadd.f32 %v1462_v34, %v1264_v21 }
 0x235   : > { %v1289_v37 = vadd.f32 %v1288_v26, %v990_v16 }
 0x236   : > { %v1468_v43 = vadd.f32 %v1463_v36, %v1438_v35 }
 0x237   : > { %v1313_v27 = vpop.f32.mrf.mxu3 }
 0x238   : > { %v1314_v29 = vadd.f32 %v1313_v27, %v1029_v62 }
 0x23a   : > { %v1465_v39 = vadd.f32 %v1314_v29, %v1289_v37 }
 0x23c   : > { %v1469_v46 = vadd.f32 %v1466_v42, %v1465_v39 }
 0x23e   : > { %v1387_v31 = vpop.f32.mrf.mxu2 }
 0x23f   : > { %v1388_v40 = vadd.f32 %v1387_v31, %v1147_v22 }
 0x241   : > { %v1412_v38 = vpop.f32.mrf.mxu3 }
 0x242   : > { %v1413_v41 = vadd.f32 %v1412_v38, %v1186_v23 }
 0x244   : > { %v1467_v32 = vadd.f32 %v1413_v41, %v1388_v40 }
 0x246   : > { %v1470_v47 = vadd.f32 %v1468_v43, %v1467_v32 }
 0x248   : > { %v1471_v49 = vadd.f32 %v1470_v47, %v1469_v46 }
 0x24a   : > { %v1476_v50 = vadd.f32 %v1851_v48, %v1471_v49 }
 0x24c   : > { %v1477_v44 = vmax.f32 %v1476_v50, 0.0 }
 0x24e   : > { %v1479_v51 = vrot.slane %v1477_v44, 1  ;;  %1481 = vst [vmem:[%s336_s24] sm:$0x1] %v1477_v44 }
 0x250   : > { %1482 = vst [vmem:[%s336_s24 + $0x1] sm:$0x1] %v1479_v51 }
 0x251   : > { %1939 = shalt.err (!%p1936_p8)
}
 0x252   : > { %s1988_s17 = smov 16   ;;  %s1989_s22 = smov 1  }
 0x253   : > { %1793 = dma.vmem_to_hbm [thread:$0]  (%p2073_p5), %s1502_s25, 32, %s1504_s26, %s1484_s10, %s1988_s17, %s1988_s17, %s1989_s22  }
 0x254 PF: > { %p1810_p9 = scmp.ge.s32.totalorder %s1982_s30, 2  ;;  %s1522_s23 = sand.u32 1, %s1970_s27  }
 0x255   : > { %s1523_s24 = scalar_lea.sflag [#allocation5], %s1522_s23 }
 0x256   : > { %p1803_p10 = pnand %p1810_p9, %p2077_p6 }
 0x258   : > { %p1804_p11 = pneg %p1803_p10 }
 0x25a   : > { %1965 = dma.done.wait (%p1804_p11), %s1523_s24, 32  }
 0x25b   : > { %1967 = vsyncadd (%p1804_p11), %s1523_s24, 4294967264  ;;  %p21_p12 = scmp.ge.s32.totalorder %s2060_s11, 4   ;;  %s2650_s27 = smov %s1974_s28 }
 0x25c   : > { %s2651_s28 = smov %s1978_s29  ;;  %s2652_s29 = smov %s2071_s14 }
 0x25d   : > { %s2653_s30 = smov %s2060_s11  ;;  %23 = sbr.rel (!%p21_p12) target bundleno = 5 (0x5), region = 127 }
 0x262   :  { %1538 = vsyncpa [#allocation4], 1 }
 0x263   :  { %1540 = vsyncpa [#allocation4 + $0x1], 1 }
 0x264   :  { %1541 = vsyncpa [#allocation7], 1 }
 0x265   :  { %1542 = vsyncpa [#allocation5], 1 }
 0x266   :  { %1544 = vsyncpa [#allocation5 + $0x1], 1 }

</bundles_post_ra>
